<compile_context>
chip_gen: v6e
topology: v6e:2x2x1
jax: 0.10.0
libtpu: 0.0.40
codegen_flags: <defaults>
</compile_context>

<pallas_src>
import math

import jax
import jax.numpy as jnp
from jax.experimental import pallas as pl
from jax.experimental.pallas import tpu as pltpu
import numpy as np


# ----------------------------- Pallas kernel ---------------------------------

def _forget1_kernel(x_ref, a_ref, h0_ref, c0_ref,
                    Wx_ref, Wh_ref, b_ref, w_ref, out_ref):
    # Per-batch views (B squeezed out by the BlockSpecs):
    #   x_ref (T,R,P), a_ref (T,R,R), h0/c0 (R,H), out_ref (T,R,H)
    T = x_ref.shape[0]
    H = h0_ref.shape[1]

    Wx = Wx_ref[...]        # (2P, 4H)
    Wh = Wh_ref[...]        # (H, 4H)
    bias = b_ref[...]       # (1, 4H)   fused biases
    w_col = w_ref[...]      # (1, H)    diag-projection column (row layout)

    def step(t, carry):
        h, c = carry
        x_t = x_ref[t]      # (R, P)
        a_t = a_ref[t]      # (R, R)

        ax = jnp.dot(a_t, x_t, preferred_element_type=jnp.float32)      # (R, P)
        x_cat = jnp.concatenate([x_t, ax], axis=-1)                     # (R, 2P)

        # One lane-dense (R, 4H) pre-activation block: [ i | f | g | o ]
        pre = (jnp.dot(x_cat, Wx, preferred_element_type=jnp.float32)
               + jnp.dot(h, Wh, preferred_element_type=jnp.float32)
               + bias)

        i_a = jax.nn.sigmoid(pre[:, 0 * H:1 * H])
        f_a = jax.nn.sigmoid(pre[:, 1 * H:2 * H])
        g_t = jnp.tanh(pre[:, 2 * H:3 * H])
        o_a = jax.nn.sigmoid(pre[:, 3 * H:4 * H])

        # (gate @ W).squeeze(-1)  ==  sum(gate * w_col, -1): VPU mul + XLU reduce
        i_d = jnp.sum(i_a * w_col, axis=-1, keepdims=True)              # (R, 1)
        f_d = jnp.sum(f_a * w_col, axis=-1, keepdims=True)
        o_d = jnp.sum(o_a * w_col, axis=-1, keepdims=True)

        # diag_embed(v) @ M  ==  v[..., None] * M  (row scaling)
        c_new = f_d * c + i_d * g_t
        h_new = o_d * jnp.tanh(c_new)

        out_ref[t] = h_new
        return h_new, c_new

    jax.lax.fori_loop(0, T, step, (h0_ref[...], c0_ref[...]), unroll=True)


# ------------------------- host-side parameter fusion -------------------------

def fuse_params(p):
    P, H = p['W_ii'].shape
    f32 = jnp.float32

    # x-side block weight for concat([x_t, a_t@x_t]) -> [i | f | g | o]
    Wx = jnp.zeros((2 * P, 4 * H), f32)
    Wx = Wx.at[:P, 0 * H:1 * H].set(p['W_ii'])
    Wx = Wx.at[P:, 1 * H:2 * H].set(p['Wn'] @ p['W_if'])   # fold (a@x)@Wn into f-gate
    Wx = Wx.at[:P, 2 * H:3 * H].set(p['W_ig'])
    Wx = Wx.at[:P, 3 * H:4 * H].set(p['W_io'])

    # fused hidden weights and biases
    Wh = jnp.concatenate([p['W_hi'], p['W_hf'], p['W_hg'], p['W_ho']], axis=1)
    b = jnp.concatenate([
        p['b_ii'] + p['b_hi'],
        p['bn'] @ p['W_if'] + p['b_if'] + p['b_hf'],       # folded bn term
        p['b_ig'] + p['b_hg'],
        p['b_io'] + p['b_ho'],
    ]).reshape(1, 4 * H).astype(f32)

    w_col = p['W'].reshape(1, H).astype(f32)               # (H,1) column as a row
    return Wx, Wh, b, w_col


# --------------------------------- wrapper -------------------------------------

def forget1_pallas(x0, a, h0, c0, params):
    T, B, R, P = x0.shape
    H = params['W_hi'].shape[0]
    Wx, Wh, b, w_col = fuse_params(params)

    full = lambda arr: pl.BlockSpec(arr.shape, lambda bi: (0,) * arr.ndim)

    grid_spec = pltpu.PrefetchScalarGridSpec(
        num_scalar_prefetch=0,
        grid=(B,),                                         # independent batch axis
        in_specs=[
            pl.BlockSpec((T, None, R, P), lambda bi: (0, bi, 0, 0)),   # x sequence
            pl.BlockSpec((T, None, R, R), lambda bi: (0, bi, 0, 0)),   # a sequence
            pl.BlockSpec((None, R, H),    lambda bi: (bi, 0, 0)),      # h0
            pl.BlockSpec((None, R, H),    lambda bi: (bi, 0, 0)),      # c0
            full(Wx), full(Wh), full(b), full(w_col),
        ],
        out_specs=pl.BlockSpec((T, None, R, H), lambda bi: (0, bi, 0, 0)),
    )

    hidden = pl.pallas_call(
        _forget1_kernel,
        grid_spec=grid_spec,
        out_shape=jax.ShapeDtypeStruct((T, B, R, H), jnp.float32),
        compiler_params=pltpu.CompilerParams(
            # batch axis is truly independent -> both TensorCores on v7x;
            # the recurrence over T lives entirely inside one grid step.
            dimension_semantics=("parallel",)),
    )(x0, a, h0, c0, Wx, Wh, b, w_col)

    # (T,B,R,H) -> (T,B,R*H): contiguous reshape in HBM, free.
    return hidden.reshape(T, B, R * H)


# --------------------------- pure-JAX reference -------------------------------
# Mirrors the torch forward op-for-op with the UNFUSED parameters.

def forget1_reference(x0, a, h0, c0, p):
    T = x0.shape[0]
    h, c = h0, c0
    outs = []
    for t in range(T):
        x_t, a_t = x0[t], a[t]
        ax = a_t @ x_t @ p['Wn'] + p['bn']
        i_ = jax.nn.sigmoid(x_t @ p['W_ii'] + p['b_ii'] + h @ p['W_hi'] + p['b_hi'])
        i_d = (i_ @ p['W'])[..., 0]
        f_ = jax.nn.sigmoid(ax @ p['W_if'] + p['b_if'] + h @ p['W_hf'] + p['b_hf'])
        f_d = (f_ @ p['W'])[..., 0]
        g_ = jnp.tanh(x_t @ p['W_ig'] + p['b_ig'] + h @ p['W_hg'] + p['b_hg'])
        o_ = jax.nn.sigmoid(x_t @ p['W_io'] + p['b_io'] + h @ p['W_ho'] + p['b_ho'])
        o_d = (o_ @ p['W'])[..., 0]
        c = f_d[..., None] * c + i_d[..., None] * g_
        h = o_d[..., None] * jnp.tanh(c)
        outs.append(h)
    B, R, H = h.shape
    return jnp.stack(outs, 0).reshape(T, B, R * H)


# ----------------------------------- main -------------------------------------

def init_params(key, p_dim, hidden_size):
    stdv = 1.0 / math.sqrt(hidden_size)
    shapes = {
        'W': (hidden_size, 1),
        'Wn': (p_dim, p_dim), 'bn': (p_dim,),
        'W_ii': (p_dim, hidden_size), 'W_hi': (hidden_size, hidden_size),
        'b_ii': (hidden_size,), 'b_hi': (hidden_size,),
        'W_if': (p_dim, hidden_size), 'W_hf': (hidden_size, hidden_size),
        'b_if': (hidden_size,), 'b_hf': (hidden_size,),
        'W_ig': (p_dim, hidden_size), 'W_hg': (hidden_size, hidden_size),
        'b_ig': (hidden_size,), 'b_hg': (hidden_size,),
        'W_io': (p_dim, hidden_size), 'W_ho': (hidden_size, hidden_size),
        'b_io': (hidden_size,), 'b_ho': (hidden_size,),
    }
    params = {}
    keys = jax.random.split(key, len(shapes))
    for k, (name, shp) in zip(keys, shapes.items()):
        params[name] = jax.random.uniform(k, shp, jnp.float32, -stdv, stdv)
    return params


if __name__ == "__main__":
    # small shapes consistent with the module (seq, batch, data_row=R, p=P, hidden=H)
    T, B, R, P, H = 4, 2, 8, 8, 32

    key = jax.random.PRNGKey(0)
    k_x, k_a, k_h, k_c, k_w = jax.random.split(key, 5)

    x0 = jax.random.normal(k_x, (T, B, R, P), jnp.float32)     # x[0]
    a_seq = jax.random.normal(k_a, (T, B, R, R), jnp.float32)  # x[1]
    # TODO(synk): torch draws h0/c0 with torch.randn inside forward(); generated
    # deterministically here and passed in as inputs instead.
    h0 = jax.random.normal(k_h, (B, R, H), jnp.float32)
    c0 = jax.random.normal(k_c, (B, R, H), jnp.float32)

    params = init_params(k_w, P, H)

    out = jax.block_until_ready(forget1_pallas(x0, a_seq, h0, c0, params))
    ref = jax.block_until_ready(forget1_reference(x0, a_seq, h0, c0, params))

    assert out.shape == (T, B, R * H), out.shape
    np.testing.assert_allclose(np.asarray(out), np.asarray(ref),
                               rtol=2e-4, atol=2e-4)
    print("KERNEL_OK")
</pallas_src>

<mosaic_0001>
module attributes {stable_mosaic.version = 11 : i64} {
  func.func @_forget1_kernel(%arg0: i32, %arg1: memref<4x1x8x8xf32, #tpu.memory_space<vmem>>, %arg2: memref<4x1x8x8xf32, #tpu.memory_space<vmem>>, %arg3: memref<1x8x32xf32, #tpu.memory_space<vmem>>, %arg4: memref<1x8x32xf32, #tpu.memory_space<vmem>>, %arg5: memref<16x128xf32, #tpu.memory_space<vmem>>, %arg6: memref<32x128xf32, #tpu.memory_space<vmem>>, %arg7: memref<1x128xf32, #tpu.memory_space<vmem>>, %arg8: memref<1x32xf32, #tpu.memory_space<vmem>>, %arg9: memref<4x1x8x32xf32, #tpu.memory_space<vmem>>) attributes {dimension_semantics = [#tpu.dimension_semantics<parallel>], iteration_bounds = array<i64: 2>, scalar_prefetch = 0 : i64, scratch_operands = 0 : i64, tpu.core_type = #tpu.core_type<tc>, window_params = [{transform_indices = @transform_0, window_bounds = array<i64: 4, 1, 8, 8>}, {transform_indices = @transform_1, window_bounds = array<i64: 4, 1, 8, 8>}, {transform_indices = @transform_2, window_bounds = array<i64: 1, 8, 32>}, {transform_indices = @transform_3, window_bounds = array<i64: 1, 8, 32>}, {pipeline_mode = #tpu.pipeline_mode<synchronous>, transform_indices = @transform_4, window_bounds = array<i64: 16, 128>}, {pipeline_mode = #tpu.pipeline_mode<synchronous>, transform_indices = @transform_5, window_bounds = array<i64: 32, 128>}, {pipeline_mode = #tpu.pipeline_mode<synchronous>, transform_indices = @transform_6, window_bounds = array<i64: 1, 128>}, {pipeline_mode = #tpu.pipeline_mode<synchronous>, transform_indices = @transform_7, window_bounds = array<i64: 1, 32>}, {transform_indices = @transform_8, window_bounds = array<i64: 4, 1, 8, 32>}]} {
    %c0 = arith.constant 0 : index
    %c0_0 = arith.constant 0 : index
    %0 = vector.load %arg5[%c0, %c0_0] : memref<16x128xf32, #tpu.memory_space<vmem>>, vector<16x128xf32>
    %c0_1 = arith.constant 0 : index
    %c0_2 = arith.constant 0 : index
    %1 = vector.load %arg6[%c0_1, %c0_2] : memref<32x128xf32, #tpu.memory_space<vmem>>, vector<32x128xf32>
    %c0_3 = arith.constant 0 : index
    %c0_4 = arith.constant 0 : index
    %2 = vector.load %arg7[%c0_3, %c0_4] : memref<1x128xf32, #tpu.memory_space<vmem>>, vector<1x128xf32>
    %c0_5 = arith.constant 0 : index
    %c0_6 = arith.constant 0 : index
    %3 = vector.load %arg8[%c0_5, %c0_6] : memref<1x32xf32, #tpu.memory_space<vmem>>, vector<1x32xf32>
    %c0_7 = arith.constant 0 : index
    %c0_8 = arith.constant 0 : index
    %c0_9 = arith.constant 0 : index
    %4 = vector.load %arg3[%c0_7, %c0_8, %c0_9] : memref<1x8x32xf32, #tpu.memory_space<vmem>>, vector<1x8x32xf32>
    %5 = vector.shape_cast %4 : vector<1x8x32xf32> to vector<8x32xf32>
    %c0_10 = arith.constant 0 : index
    %c0_11 = arith.constant 0 : index
    %c0_12 = arith.constant 0 : index
    %6 = vector.load %arg4[%c0_10, %c0_11, %c0_12] : memref<1x8x32xf32, #tpu.memory_space<vmem>>, vector<1x8x32xf32>
    %7 = vector.shape_cast %6 : vector<1x8x32xf32> to vector<8x32xf32>
    %c0_i32 = arith.constant 0 : i32
    %8 = arith.index_cast %c0_i32 : i32 to index
    %c0_13 = arith.constant 0 : index
    %c0_14 = arith.constant 0 : index
    %c0_15 = arith.constant 0 : index
    %9 = vector.load %arg1[%8, %c0_13, %c0_14, %c0_15] : memref<4x1x8x8xf32, #tpu.memory_space<vmem>>, vector<1x1x8x8xf32>
    %10 = vector.shape_cast %9 : vector<1x1x8x8xf32> to vector<8x8xf32>
    %11 = arith.index_cast %c0_i32 : i32 to index
    %c0_16 = arith.constant 0 : index
    %c0_17 = arith.constant 0 : index
    %c0_18 = arith.constant 0 : index
    %12 = vector.load %arg2[%11, %c0_16, %c0_17, %c0_18] : memref<4x1x8x8xf32, #tpu.memory_space<vmem>>, vector<1x1x8x8xf32>
    %13 = vector.shape_cast %12 : vector<1x1x8x8xf32> to vector<8x8xf32>
    %cst = arith.constant dense<0.000000e+00> : vector<8x8xf32>
    %14 = tpu.matmul %13, %10, %cst {dimension_numbers = #tpu.dot_dimension_numbers<[1], [0], [0], [1], [0, 0, 1, 1], [], []>} : vector<8x8xf32>, vector<8x8xf32>, vector<8x8xf32> -> vector<8x8xf32>
    %15 = tpu.concatenate %10, %14 in 1 : vector<8x8xf32>, vector<8x8xf32> -> vector<8x16xf32>
    %cst_19 = arith.constant dense<0.000000e+00> : vector<8x128xf32>
    %16 = tpu.matmul %15, %0, %cst_19 {dimension_numbers = #tpu.dot_dimension_numbers<[1], [0], [0], [1], [0, 0, 1, 1], [], []>} : vector<8x16xf32>, vector<16x128xf32>, vector<8x128xf32> -> vector<8x128xf32>
    %cst_20 = arith.constant dense<0.000000e+00> : vector<8x128xf32>
    %17 = tpu.matmul %5, %1, %cst_20 {dimension_numbers = #tpu.dot_dimension_numbers<[1], [0], [0], [1], [0, 0, 1, 1], [], []>} : vector<8x32xf32>, vector<32x128xf32>, vector<8x128xf32> -> vector<8x128xf32>
    %18 = arith.addf %16, %17 : vector<8x128xf32>
    %19 = vector.broadcast %2 : vector<1x128xf32> to vector<8x128xf32>
    %20 = arith.addf %18, %19 : vector<8x128xf32>
    %21 = vector.extract_strided_slice %20 {offsets = [0, 0], sizes = [8, 32], strides = [1, 1]} : vector<8x128xf32> to vector<8x32xf32>
    %22 = arith.negf %21 : vector<8x32xf32>
    %23 = math.exp %22 : vector<8x32xf32>
    %cst_21 = arith.constant 1.000000e+00 : f32
    %24 = vector.broadcast %cst_21 : f32 to vector<8x32xf32>
    %25 = arith.addf %24, %23 : vector<8x32xf32>
    %26 = arith.divf %24, %25 : vector<8x32xf32>
    %27 = vector.extract_strided_slice %20 {offsets = [0, 32], sizes = [8, 32], strides = [1, 1]} : vector<8x128xf32> to vector<8x32xf32>
    %28 = arith.negf %27 : vector<8x32xf32>
    %29 = math.exp %28 : vector<8x32xf32>
    %cst_22 = arith.constant 1.000000e+00 : f32
    %30 = vector.broadcast %cst_22 : f32 to vector<8x32xf32>
    %31 = arith.addf %30, %29 : vector<8x32xf32>
    %32 = arith.divf %30, %31 : vector<8x32xf32>
    %33 = vector.extract_strided_slice %20 {offsets = [0, 64], sizes = [8, 32], strides = [1, 1]} : vector<8x128xf32> to vector<8x32xf32>
    %34 = math.tanh %33 : vector<8x32xf32>
    %35 = vector.extract_strided_slice %20 {offsets = [0, 96], sizes = [8, 32], strides = [1, 1]} : vector<8x128xf32> to vector<8x32xf32>
    %36 = arith.negf %35 : vector<8x32xf32>
    %37 = math.exp %36 : vector<8x32xf32>
    %cst_23 = arith.constant 1.000000e+00 : f32
    %38 = vector.broadcast %cst_23 : f32 to vector<8x32xf32>
    %39 = arith.addf %38, %37 : vector<8x32xf32>
    %40 = arith.divf %38, %39 : vector<8x32xf32>
    %41 = vector.broadcast %3 : vector<1x32xf32> to vector<8x32xf32>
    %42 = arith.mulf %26, %41 : vector<8x32xf32>
    %cst_24 = arith.constant dense<0.000000e+00> : vector<8xf32>
    %43 = vector.multi_reduction <add>, %42, %cst_24 [1] : vector<8x32xf32> to vector<8xf32>
    %44 = vector.shape_cast %43 : vector<8xf32> to vector<8x1xf32>
    %45 = vector.broadcast %3 : vector<1x32xf32> to vector<8x32xf32>
    %46 = arith.mulf %32, %45 : vector<8x32xf32>
    %cst_25 = arith.constant dense<0.000000e+00> : vector<8xf32>
    %47 = vector.multi_reduction <add>, %46, %cst_25 [1] : vector<8x32xf32> to vector<8xf32>
    %48 = vector.shape_cast %47 : vector<8xf32> to vector<8x1xf32>
    %49 = vector.broadcast %3 : vector<1x32xf32> to vector<8x32xf32>
    %50 = arith.mulf %40, %49 : vector<8x32xf32>
    %cst_26 = arith.constant dense<0.000000e+00> : vector<8xf32>
    %51 = vector.multi_reduction <add>, %50, %cst_26 [1] : vector<8x32xf32> to vector<8xf32>
    %52 = vector.shape_cast %51 : vector<8xf32> to vector<8x1xf32>
    %53 = vector.broadcast %48 : vector<8x1xf32> to vector<8x32xf32>
    %54 = arith.mulf %53, %7 : vector<8x32xf32>
    %55 = vector.broadcast %44 : vector<8x1xf32> to vector<8x32xf32>
    %56 = arith.mulf %55, %34 : vector<8x32xf32>
    %57 = arith.addf %54, %56 : vector<8x32xf32>
    %58 = math.tanh %57 : vector<8x32xf32>
    %59 = vector.broadcast %52 : vector<8x1xf32> to vector<8x32xf32>
    %60 = arith.mulf %59, %58 : vector<8x32xf32>
    %61 = arith.index_cast %c0_i32 : i32 to index
    %c0_27 = arith.constant 0 : index
    %c0_28 = arith.constant 0 : index
    %c0_29 = arith.constant 0 : index
    %62 = vector.load %arg9[%61, %c0_27, %c0_28, %c0_29] : memref<4x1x8x32xf32, #tpu.memory_space<vmem>>, vector<1x1x8x32xf32>
    %63 = vector.shape_cast %62 : vector<1x1x8x32xf32> to vector<8x32xf32>
    %64 = vector.shape_cast %60 : vector<8x32xf32> to vector<1x1x8x32xf32>
    tpu.vector_store %arg9[%61, %c0_27, %c0_28, %c0_29], %64 {strides = array<i32>} : memref<4x1x8x32xf32, #tpu.memory_space<vmem>>, vector<1x1x8x32xf32>,
    %c1_i32 = arith.constant 1 : i32
    %65 = arith.index_cast %c1_i32 : i32 to index
    %c0_30 = arith.constant 0 : index
    %c0_31 = arith.constant 0 : index
    %c0_32 = arith.constant 0 : index
    %66 = vector.load %arg1[%65, %c0_30, %c0_31, %c0_32] : memref<4x1x8x8xf32, #tpu.memory_space<vmem>>, vector<1x1x8x8xf32>
    %67 = vector.shape_cast %66 : vector<1x1x8x8xf32> to vector<8x8xf32>
    %68 = arith.index_cast %c1_i32 : i32 to index
    %c0_33 = arith.constant 0 : index
    %c0_34 = arith.constant 0 : index
    %c0_35 = arith.constant 0 : index
    %69 = vector.load %arg2[%68, %c0_33, %c0_34, %c0_35] : memref<4x1x8x8xf32, #tpu.memory_space<vmem>>, vector<1x1x8x8xf32>
    %70 = vector.shape_cast %69 : vector<1x1x8x8xf32> to vector<8x8xf32>
    %cst_36 = arith.constant dense<0.000000e+00> : vector<8x8xf32>
    %71 = tpu.matmul %70, %67, %cst_36 {dimension_numbers = #tpu.dot_dimension_numbers<[1], [0], [0], [1], [0, 0, 1, 1], [], []>} : vector<8x8xf32>, vector<8x8xf32>, vector<8x8xf32> -> vector<8x8xf32>
    %72 = tpu.concatenate %67, %71 in 1 : vector<8x8xf32>, vector<8x8xf32> -> vector<8x16xf32>
    %cst_37 = arith.constant dense<0.000000e+00> : vector<8x128xf32>
    %73 = tpu.matmul %72, %0, %cst_37 {dimension_numbers = #tpu.dot_dimension_numbers<[1], [0], [0], [1], [0, 0, 1, 1], [], []>} : vector<8x16xf32>, vector<16x128xf32>, vector<8x128xf32> -> vector<8x128xf32>
    %cst_38 = arith.constant dense<0.000000e+00> : vector<8x128xf32>
    %74 = tpu.matmul %60, %1, %cst_38 {dimension_numbers = #tpu.dot_dimension_numbers<[1], [0], [0], [1], [0, 0, 1, 1], [], []>} : vector<8x32xf32>, vector<32x128xf32>, vector<8x128xf32> -> vector<8x128xf32>
    %75 = arith.addf %73, %74 : vector<8x128xf32>
    %76 = vector.broadcast %2 : vector<1x128xf32> to vector<8x128xf32>
    %77 = arith.addf %75, %76 : vector<8x128xf32>
    %78 = vector.extract_strided_slice %77 {offsets = [0, 0], sizes = [8, 32], strides = [1, 1]} : vector<8x128xf32> to vector<8x32xf32>
    %79 = arith.negf %78 : vector<8x32xf32>
    %80 = math.exp %79 : vector<8x32xf32>
    %cst_39 = arith.constant 1.000000e+00 : f32
    %81 = vector.broadcast %cst_39 : f32 to vector<8x32xf32>
    %82 = arith.addf %81, %80 : vector<8x32xf32>
    %83 = arith.divf %81, %82 : vector<8x32xf32>
    %84 = vector.extract_strided_slice %77 {offsets = [0, 32], sizes = [8, 32], strides = [1, 1]} : vector<8x128xf32> to vector<8x32xf32>
    %85 = arith.negf %84 : vector<8x32xf32>
    %86 = math.exp %85 : vector<8x32xf32>
    %cst_40 = arith.constant 1.000000e+00 : f32
    %87 = vector.broadcast %cst_40 : f32 to vector<8x32xf32>
    %88 = arith.addf %87, %86 : vector<8x32xf32>
    %89 = arith.divf %87, %88 : vector<8x32xf32>
    %90 = vector.extract_strided_slice %77 {offsets = [0, 64], sizes = [8, 32], strides = [1, 1]} : vector<8x128xf32> to vector<8x32xf32>
    %91 = math.tanh %90 : vector<8x32xf32>
    %92 = vector.extract_strided_slice %77 {offsets = [0, 96], sizes = [8, 32], strides = [1, 1]} : vector<8x128xf32> to vector<8x32xf32>
    %93 = arith.negf %92 : vector<8x32xf32>
    %94 = math.exp %93 : vector<8x32xf32>
    %cst_41 = arith.constant 1.000000e+00 : f32
    %95 = vector.broadcast %cst_41 : f32 to vector<8x32xf32>
    %96 = arith.addf %95, %94 : vector<8x32xf32>
    %97 = arith.divf %95, %96 : vector<8x32xf32>
    %98 = vector.broadcast %3 : vector<1x32xf32> to vector<8x32xf32>
    %99 = arith.mulf %83, %98 : vector<8x32xf32>
    %cst_42 = arith.constant dense<0.000000e+00> : vector<8xf32>
    %100 = vector.multi_reduction <add>, %99, %cst_42 [1] : vector<8x32xf32> to vector<8xf32>
    %101 = vector.shape_cast %100 : vector<8xf32> to vector<8x1xf32>
    %102 = vector.broadcast %3 : vector<1x32xf32> to vector<8x32xf32>
    %103 = arith.mulf %89, %102 : vector<8x32xf32>
    %cst_43 = arith.constant dense<0.000000e+00> : vector<8xf32>
    %104 = vector.multi_reduction <add>, %103, %cst_43 [1] : vector<8x32xf32> to vector<8xf32>
    %105 = vector.shape_cast %104 : vector<8xf32> to vector<8x1xf32>
    %106 = vector.broadcast %3 : vector<1x32xf32> to vector<8x32xf32>
    %107 = arith.mulf %97, %106 : vector<8x32xf32>
    %cst_44 = arith.constant dense<0.000000e+00> : vector<8xf32>
    %108 = vector.multi_reduction <add>, %107, %cst_44 [1] : vector<8x32xf32> to vector<8xf32>
    %109 = vector.shape_cast %108 : vector<8xf32> to vector<8x1xf32>
    %110 = vector.broadcast %105 : vector<8x1xf32> to vector<8x32xf32>
    %111 = arith.mulf %110, %57 : vector<8x32xf32>
    %112 = vector.broadcast %101 : vector<8x1xf32> to vector<8x32xf32>
    %113 = arith.mulf %112, %91 : vector<8x32xf32>
    %114 = arith.addf %111, %113 : vector<8x32xf32>
    %115 = math.tanh %114 : vector<8x32xf32>
    %116 = vector.broadcast %109 : vector<8x1xf32> to vector<8x32xf32>
    %117 = arith.mulf %116, %115 : vector<8x32xf32>
    %118 = arith.index_cast %c1_i32 : i32 to index
    %c0_45 = arith.constant 0 : index
    %c0_46 = arith.constant 0 : index
    %c0_47 = arith.constant 0 : index
    %119 = vector.load %arg9[%118, %c0_45, %c0_46, %c0_47] : memref<4x1x8x32xf32, #tpu.memory_space<vmem>>, vector<1x1x8x32xf32>
    %120 = vector.shape_cast %119 : vector<1x1x8x32xf32> to vector<8x32xf32>
    %121 = vector.shape_cast %117 : vector<8x32xf32> to vector<1x1x8x32xf32>
    tpu.vector_store %arg9[%118, %c0_45, %c0_46, %c0_47], %121 {strides = array<i32>} : memref<4x1x8x32xf32, #tpu.memory_space<vmem>>, vector<1x1x8x32xf32>,
    %c2_i32 = arith.constant 2 : i32
    %122 = arith.index_cast %c2_i32 : i32 to index
    %c0_48 = arith.constant 0 : index
    %c0_49 = arith.constant 0 : index
    %c0_50 = arith.constant 0 : index
    %123 = vector.load %arg1[%122, %c0_48, %c0_49, %c0_50] : memref<4x1x8x8xf32, #tpu.memory_space<vmem>>, vector<1x1x8x8xf32>
    %124 = vector.shape_cast %123 : vector<1x1x8x8xf32> to vector<8x8xf32>
    %125 = arith.index_cast %c2_i32 : i32 to index
    %c0_51 = arith.constant 0 : index
    %c0_52 = arith.constant 0 : index
    %c0_53 = arith.constant 0 : index
    %126 = vector.load %arg2[%125, %c0_51, %c0_52, %c0_53] : memref<4x1x8x8xf32, #tpu.memory_space<vmem>>, vector<1x1x8x8xf32>
    %127 = vector.shape_cast %126 : vector<1x1x8x8xf32> to vector<8x8xf32>
    %cst_54 = arith.constant dense<0.000000e+00> : vector<8x8xf32>
    %128 = tpu.matmul %127, %124, %cst_54 {dimension_numbers = #tpu.dot_dimension_numbers<[1], [0], [0], [1], [0, 0, 1, 1], [], []>} : vector<8x8xf32>, vector<8x8xf32>, vector<8x8xf32> -> vector<8x8xf32>
    %129 = tpu.concatenate %124, %128 in 1 : vector<8x8xf32>, vector<8x8xf32> -> vector<8x16xf32>
    %cst_55 = arith.constant dense<0.000000e+00> : vector<8x128xf32>
    %130 = tpu.matmul %129, %0, %cst_55 {dimension_numbers = #tpu.dot_dimension_numbers<[1], [0], [0], [1], [0, 0, 1, 1], [], []>} : vector<8x16xf32>, vector<16x128xf32>, vector<8x128xf32> -> vector<8x128xf32>
    %cst_56 = arith.constant dense<0.000000e+00> : vector<8x128xf32>
    %131 = tpu.matmul %117, %1, %cst_56 {dimension_numbers = #tpu.dot_dimension_numbers<[1], [0], [0], [1], [0, 0, 1, 1], [], []>} : vector<8x32xf32>, vector<32x128xf32>, vector<8x128xf32> -> vector<8x128xf32>
    %132 = arith.addf %130, %131 : vector<8x128xf32>
    %133 = vector.broadcast %2 : vector<1x128xf32> to vector<8x128xf32>
    %134 = arith.addf %132, %133 : vector<8x128xf32>
    %135 = vector.extract_strided_slice %134 {offsets = [0, 0], sizes = [8, 32], strides = [1, 1]} : vector<8x128xf32> to vector<8x32xf32>
    %136 = arith.negf %135 : vector<8x32xf32>
    %137 = math.exp %136 : vector<8x32xf32>
    %cst_57 = arith.constant 1.000000e+00 : f32
    %138 = vector.broadcast %cst_57 : f32 to vector<8x32xf32>
    %139 = arith.addf %138, %137 : vector<8x32xf32>
    %140 = arith.divf %138, %139 : vector<8x32xf32>
    %141 = vector.extract_strided_slice %134 {offsets = [0, 32], sizes = [8, 32], strides = [1, 1]} : vector<8x128xf32> to vector<8x32xf32>
    %142 = arith.negf %141 : vector<8x32xf32>
    %143 = math.exp %142 : vector<8x32xf32>
    %cst_58 = arith.constant 1.000000e+00 : f32
    %144 = vector.broadcast %cst_58 : f32 to vector<8x32xf32>
    %145 = arith.addf %144, %143 : vector<8x32xf32>
    %146 = arith.divf %144, %145 : vector<8x32xf32>
    %147 = vector.extract_strided_slice %134 {offsets = [0, 64], sizes = [8, 32], strides = [1, 1]} : vector<8x128xf32> to vector<8x32xf32>
    %148 = math.tanh %147 : vector<8x32xf32>
    %149 = vector.extract_strided_slice %134 {offsets = [0, 96], sizes = [8, 32], strides = [1, 1]} : vector<8x128xf32> to vector<8x32xf32>
    %150 = arith.negf %149 : vector<8x32xf32>
    %151 = math.exp %150 : vector<8x32xf32>
    %cst_59 = arith.constant 1.000000e+00 : f32
    %152 = vector.broadcast %cst_59 : f32 to vector<8x32xf32>
    %153 = arith.addf %152, %151 : vector<8x32xf32>
    %154 = arith.divf %152, %153 : vector<8x32xf32>
    %155 = vector.broadcast %3 : vector<1x32xf32> to vector<8x32xf32>
    %156 = arith.mulf %140, %155 : vector<8x32xf32>
    %cst_60 = arith.constant dense<0.000000e+00> : vector<8xf32>
    %157 = vector.multi_reduction <add>, %156, %cst_60 [1] : vector<8x32xf32> to vector<8xf32>
    %158 = vector.shape_cast %157 : vector<8xf32> to vector<8x1xf32>
    %159 = vector.broadcast %3 : vector<1x32xf32> to vector<8x32xf32>
    %160 = arith.mulf %146, %159 : vector<8x32xf32>
    %cst_61 = arith.constant dense<0.000000e+00> : vector<8xf32>
    %161 = vector.multi_reduction <add>, %160, %cst_61 [1] : vector<8x32xf32> to vector<8xf32>
    %162 = vector.shape_cast %161 : vector<8xf32> to vector<8x1xf32>
    %163 = vector.broadcast %3 : vector<1x32xf32> to vector<8x32xf32>
    %164 = arith.mulf %154, %163 : vector<8x32xf32>
    %cst_62 = arith.constant dense<0.000000e+00> : vector<8xf32>
    %165 = vector.multi_reduction <add>, %164, %cst_62 [1] : vector<8x32xf32> to vector<8xf32>
    %166 = vector.shape_cast %165 : vector<8xf32> to vector<8x1xf32>
    %167 = vector.broadcast %162 : vector<8x1xf32> to vector<8x32xf32>
    %168 = arith.mulf %167, %114 : vector<8x32xf32>
    %169 = vector.broadcast %158 : vector<8x1xf32> to vector<8x32xf32>
    %170 = arith.mulf %169, %148 : vector<8x32xf32>
    %171 = arith.addf %168, %170 : vector<8x32xf32>
    %172 = math.tanh %171 : vector<8x32xf32>
    %173 = vector.broadcast %166 : vector<8x1xf32> to vector<8x32xf32>
    %174 = arith.mulf %173, %172 : vector<8x32xf32>
    %175 = arith.index_cast %c2_i32 : i32 to index
    %c0_63 = arith.constant 0 : index
    %c0_64 = arith.constant 0 : index
    %c0_65 = arith.constant 0 : index
    %176 = vector.load %arg9[%175, %c0_63, %c0_64, %c0_65] : memref<4x1x8x32xf32, #tpu.memory_space<vmem>>, vector<1x1x8x32xf32>
    %177 = vector.shape_cast %176 : vector<1x1x8x32xf32> to vector<8x32xf32>
    %178 = vector.shape_cast %174 : vector<8x32xf32> to vector<1x1x8x32xf32>
    tpu.vector_store %arg9[%175, %c0_63, %c0_64, %c0_65], %178 {strides = array<i32>} : memref<4x1x8x32xf32, #tpu.memory_space<vmem>>, vector<1x1x8x32xf32>,
    %c3_i32 = arith.constant 3 : i32
    %179 = arith.index_cast %c3_i32 : i32 to index
    %c0_66 = arith.constant 0 : index
    %c0_67 = arith.constant 0 : index
    %c0_68 = arith.constant 0 : index
    %180 = vector.load %arg1[%179, %c0_66, %c0_67, %c0_68] : memref<4x1x8x8xf32, #tpu.memory_space<vmem>>, vector<1x1x8x8xf32>
    %181 = vector.shape_cast %180 : vector<1x1x8x8xf32> to vector<8x8xf32>
    %182 = arith.index_cast %c3_i32 : i32 to index
    %c0_69 = arith.constant 0 : index
    %c0_70 = arith.constant 0 : index
    %c0_71 = arith.constant 0 : index
    %183 = vector.load %arg2[%182, %c0_69, %c0_70, %c0_71] : memref<4x1x8x8xf32, #tpu.memory_space<vmem>>, vector<1x1x8x8xf32>
    %184 = vector.shape_cast %183 : vector<1x1x8x8xf32> to vector<8x8xf32>
    %cst_72 = arith.constant dense<0.000000e+00> : vector<8x8xf32>
    %185 = tpu.matmul %184, %181, %cst_72 {dimension_numbers = #tpu.dot_dimension_numbers<[1], [0], [0], [1], [0, 0, 1, 1], [], []>} : vector<8x8xf32>, vector<8x8xf32>, vector<8x8xf32> -> vector<8x8xf32>
    %186 = tpu.concatenate %181, %185 in 1 : vector<8x8xf32>, vector<8x8xf32> -> vector<8x16xf32>
    %cst_73 = arith.constant dense<0.000000e+00> : vector<8x128xf32>
    %187 = tpu.matmul %186, %0, %cst_73 {dimension_numbers = #tpu.dot_dimension_numbers<[1], [0], [0], [1], [0, 0, 1, 1], [], []>} : vector<8x16xf32>, vector<16x128xf32>, vector<8x128xf32> -> vector<8x128xf32>
    %cst_74 = arith.constant dense<0.000000e+00> : vector<8x128xf32>
    %188 = tpu.matmul %174, %1, %cst_74 {dimension_numbers = #tpu.dot_dimension_numbers<[1], [0], [0], [1], [0, 0, 1, 1], [], []>} : vector<8x32xf32>, vector<32x128xf32>, vector<8x128xf32> -> vector<8x128xf32>
    %189 = arith.addf %187, %188 : vector<8x128xf32>
    %190 = vector.broadcast %2 : vector<1x128xf32> to vector<8x128xf32>
    %191 = arith.addf %189, %190 : vector<8x128xf32>
    %192 = vector.extract_strided_slice %191 {offsets = [0, 0], sizes = [8, 32], strides = [1, 1]} : vector<8x128xf32> to vector<8x32xf32>
    %193 = arith.negf %192 : vector<8x32xf32>
    %194 = math.exp %193 : vector<8x32xf32>
    %cst_75 = arith.constant 1.000000e+00 : f32
    %195 = vector.broadcast %cst_75 : f32 to vector<8x32xf32>
    %196 = arith.addf %195, %194 : vector<8x32xf32>
    %197 = arith.divf %195, %196 : vector<8x32xf32>
    %198 = vector.extract_strided_slice %191 {offsets = [0, 32], sizes = [8, 32], strides = [1, 1]} : vector<8x128xf32> to vector<8x32xf32>
    %199 = arith.negf %198 : vector<8x32xf32>
    %200 = math.exp %199 : vector<8x32xf32>
    %cst_76 = arith.constant 1.000000e+00 : f32
    %201 = vector.broadcast %cst_76 : f32 to vector<8x32xf32>
    %202 = arith.addf %201, %200 : vector<8x32xf32>
    %203 = arith.divf %201, %202 : vector<8x32xf32>
    %204 = vector.extract_strided_slice %191 {offsets = [0, 64], sizes = [8, 32], strides = [1, 1]} : vector<8x128xf32> to vector<8x32xf32>
    %205 = math.tanh %204 : vector<8x32xf32>
    %206 = vector.extract_strided_slice %191 {offsets = [0, 96], sizes = [8, 32], strides = [1, 1]} : vector<8x128xf32> to vector<8x32xf32>
    %207 = arith.negf %206 : vector<8x32xf32>
    %208 = math.exp %207 : vector<8x32xf32>
    %cst_77 = arith.constant 1.000000e+00 : f32
    %209 = vector.broadcast %cst_77 : f32 to vector<8x32xf32>
    %210 = arith.addf %209, %208 : vector<8x32xf32>
    %211 = arith.divf %209, %210 : vector<8x32xf32>
    %212 = vector.broadcast %3 : vector<1x32xf32> to vector<8x32xf32>
    %213 = arith.mulf %197, %212 : vector<8x32xf32>
    %cst_78 = arith.constant dense<0.000000e+00> : vector<8xf32>
    %214 = vector.multi_reduction <add>, %213, %cst_78 [1] : vector<8x32xf32> to vector<8xf32>
    %215 = vector.shape_cast %214 : vector<8xf32> to vector<8x1xf32>
    %216 = vector.broadcast %3 : vector<1x32xf32> to vector<8x32xf32>
    %217 = arith.mulf %203, %216 : vector<8x32xf32>
    %cst_79 = arith.constant dense<0.000000e+00> : vector<8xf32>
    %218 = vector.multi_reduction <add>, %217, %cst_79 [1] : vector<8x32xf32> to vector<8xf32>
    %219 = vector.shape_cast %218 : vector<8xf32> to vector<8x1xf32>
    %220 = vector.broadcast %3 : vector<1x32xf32> to vector<8x32xf32>
    %221 = arith.mulf %211, %220 : vector<8x32xf32>
    %cst_80 = arith.constant dense<0.000000e+00> : vector<8xf32>
    %222 = vector.multi_reduction <add>, %221, %cst_80 [1] : vector<8x32xf32> to vector<8xf32>
    %223 = vector.shape_cast %222 : vector<8xf32> to vector<8x1xf32>
    %224 = vector.broadcast %219 : vector<8x1xf32> to vector<8x32xf32>
    %225 = arith.mulf %224, %171 : vector<8x32xf32>
    %226 = vector.broadcast %215 : vector<8x1xf32> to vector<8x32xf32>
    %227 = arith.mulf %226, %205 : vector<8x32xf32>
    %228 = arith.addf %225, %227 : vector<8x32xf32>
    %229 = math.tanh %228 : vector<8x32xf32>
    %230 = vector.broadcast %223 : vector<8x1xf32> to vector<8x32xf32>
    %231 = arith.mulf %230, %229 : vector<8x32xf32>
    %232 = arith.index_cast %c3_i32 : i32 to index
    %c0_81 = arith.constant 0 : index
    %c0_82 = arith.constant 0 : index
    %c0_83 = arith.constant 0 : index
    %233 = vector.load %arg9[%232, %c0_81, %c0_82, %c0_83] : memref<4x1x8x32xf32, #tpu.memory_space<vmem>>, vector<1x1x8x32xf32>
    %234 = vector.shape_cast %233 : vector<1x1x8x32xf32> to vector<8x32xf32>
    %235 = vector.shape_cast %231 : vector<8x32xf32> to vector<1x1x8x32xf32>
    tpu.vector_store %arg9[%232, %c0_81, %c0_82, %c0_83], %235 {strides = array<i32>} : memref<4x1x8x32xf32, #tpu.memory_space<vmem>>, vector<1x1x8x32xf32>,
    %c4_i32 = arith.constant 4 : i32
    return
  }
  func.func @transform_0(%arg0: i32) -> (i32, i32, i32, i32) {
    %c0_i32 = arith.constant 0 : i32
    %c0_i32_0 = arith.constant 0 : i32
    %c0_i32_1 = arith.constant 0 : i32
    %c0_i32_2 = arith.constant 0 : i32
    return %c0_i32, %arg0, %c0_i32_0, %c0_i32_1 : i32, i32, i32, i32
  }
  func.func @transform_1(%arg0: i32) -> (i32, i32, i32, i32) {
    %c0_i32 = arith.constant 0 : i32
    %c0_i32_0 = arith.constant 0 : i32
    %c0_i32_1 = arith.constant 0 : i32
    %c0_i32_2 = arith.constant 0 : i32
    return %c0_i32, %arg0, %c0_i32_0, %c0_i32_1 : i32, i32, i32, i32
  }
  func.func @transform_2(%arg0: i32) -> (i32, i32, i32) {
    %c0_i32 = arith.constant 0 : i32
    %c0_i32_0 = arith.constant 0 : i32
    %c0_i32_1 = arith.constant 0 : i32
    return %arg0, %c0_i32, %c0_i32_0 : i32, i32, i32
  }
  func.func @transform_3(%arg0: i32) -> (i32, i32, i32) {
    %c0_i32 = arith.constant 0 : i32
    %c0_i32_0 = arith.constant 0 : i32
    %c0_i32_1 = arith.constant 0 : i32
    return %arg0, %c0_i32, %c0_i32_0 : i32, i32, i32
  }
  func.func @transform_4(%arg0: i32) -> (i32, i32) {
    %c0_i32 = arith.constant 0 : i32
    %c0_i32_0 = arith.constant 0 : i32
    %c0_i32_1 = arith.constant 0 : i32
    return %c0_i32, %c0_i32_0 : i32, i32
  }
  func.func @transform_5(%arg0: i32) -> (i32, i32) {
    %c0_i32 = arith.constant 0 : i32
    %c0_i32_0 = arith.constant 0 : i32
    %c0_i32_1 = arith.constant 0 : i32
    return %c0_i32, %c0_i32_0 : i32, i32
  }
  func.func @transform_6(%arg0: i32) -> (i32, i32) {
    %c0_i32 = arith.constant 0 : i32
    %c0_i32_0 = arith.constant 0 : i32
    %c0_i32_1 = arith.constant 0 : i32
    return %c0_i32, %c0_i32_0 : i32, i32
  }
  func.func @transform_7(%arg0: i32) -> (i32, i32) {
    %c0_i32 = arith.constant 0 : i32
    %c0_i32_0 = arith.constant 0 : i32
    %c0_i32_1 = arith.constant 0 : i32
    return %c0_i32, %c0_i32_0 : i32, i32
  }
  func.func @transform_8(%arg0: i32) -> (i32, i32, i32, i32) {
    %c0_i32 = arith.constant 0 : i32
    %c0_i32_0 = arith.constant 0 : i32
    %c0_i32_1 = arith.constant 0 : i32
    %c0_i32_2 = arith.constant 0 : i32
    return %c0_i32, %arg0, %c0_i32_0, %c0_i32_1 : i32, i32, i32, i32
  }
}

</mosaic_0001>

<bundles_post_ra>
// kernel: tpu_custom_call.1
= control target key start
LH: loop header
LB: loop body
LE: loop exit
PB: predicated region body
PF: predicated region fallthrough
CT: control target
= control target key end

     0   :  { %s2871_s0 = inlined_call_operand.hbm [shape: f32[4,2,8,8], index: 0, kind: input, shape index: {}]   ;;  %s2872_s1 = inlined_call_operand.hbm [shape: f32[4,2,8,8], index: 1, kind: input, shape index: {}]   ;;  %s2873_s2 = inlined_call_operand.hbm [shape: f32[2,8,32], index: 2, kind: input, shape index: {}]   ;;  %s2874_s3 = inlined_call_operand.hbm [shape: f32[2,8,32], index: 3, kind: input, shape index: {}]   ;;  %s2875_s4 = inlined_call_operand.hbm [shape: f32[16,128], index: 4, kind: input, shape index: {}]   ;;  %s2876_s5 = inlined_call_operand.hbm [shape: f32[32,128], index: 5, kind: input, shape index: {}]   ;;  %s2877_s6 = inlined_call_operand.vmem [shape: f32[1,128], index: 6, kind: input, shape index: {}]   ;;  %s2878_s7 = inlined_call_operand.vmem [shape: f32[1,32], index: 7, kind: input, shape index: {}]   ;;  %s2879_s8 = inlined_call_operand.hbm [shape: f32[4,2,8,32], index: 8, kind: output, shape index: {}]  }
   0x1   :  { %2901 = sst [smem:[#allocation26_spill]] %s2871_s0 }
   0x2   :  { %2902 = sst [smem:[#allocation27_spill]] %s2872_s1 }
   0x3   :  { %2903 = sst [smem:[#allocation28_spill]] %s2875_s4 }
   0x4   :  { %2904 = sst [smem:[#allocation29_spill]] %s2876_s5 }
   0x5   :  { %2905 = sst [smem:[#allocation30_spill]] %s2877_s6 }
   0x6   :  { %2906 = sst [smem:[#allocation31_spill]] %s2879_s8 }
   0x7   :  { %13 = vsyncpa [#allocation3], 0 }
   0x8   :  { %15 = vsyncpa [#allocation3 + $0x1], 0 }
   0x9   :  { %16 = vsyncpa [#allocation6], 0 }
   0xa   :  { %18 = vsyncpa [#allocation6 + $0x1], 0 }
   0xb   :  { %19 = vsyncpa [#allocation9], 0 }
   0xc   :  { %21 = vsyncpa [#allocation9 + $0x1], 0 }
   0xd   :  { %22 = vsyncpa [#allocation12], 0 }
   0xe   :  { %23 = vsyncpa [#allocation4], 0 }
   0xf   :  { %25 = vsyncpa [#allocation4 + $0x1], 0  ;;  %s2347_s27 = smov 0   ;;  %s2349_s28 = smov 0  }
  0x10   :  { %s2351_s29 = smov 0   ;;  %s2353_s30 = smov 0  }
  0x11 LB: > { %2907 = sst [smem:[#allocation20_spill]] %s2270_s27  ;;  %s2368_s9 = sadd.s32 4294967295, %s2282_s30   ;;  %s2282_s30 = sphi %s2353_s30, %s2947_s30   ;;  %s2278_s29 = sphi %s2351_s29, %s2949_s29   ;;  %s2274_s28 = sphi %s2349_s28, %s2951_s28   ;;  %s2270_s27 = sphi %s2347_s27, %s2950_s27  }
  0x12   : > { %2908 = sst [smem:[#allocation21_spill]] %s2278_s29  ;;  %s1729_s10 = sadd.s32 4294967294, %s2282_s30  }
  0x13   : > { %s2372_s11 = sadd.s32 1, %s2282_s30   ;;  %s38_s12 = sadd.s32 1, %s2278_s29 }
  0x14   : > { %2909 = sst [smem:[#allocation22_spill]] %s2372_s11  ;;  %s35_s13 = ssub.s32 %s2282_s30, %s2372_s11 }
  0x15   : > { %p45_p0 = scmp.ne.s32.totalorder %s2278_s29, %s2274_s28  ;;  %p36_p1 = scmp.eq.s32.totalorder %s35_s13, 0 }
  0x16   : > { %p46_p2 = scmp.eq.s32.totalorder %s2282_s30, 0  ;;  %p51_p3 = scmp.ne.s32.totalorder %s2274_s28, %s2270_s27 }
  0x17   : > { %p2880_p4 = scmp.eq.s32.totalorder %s2368_s9, 0  ;;  %p237_p7 = scmp.eq.s32.totalorder %s2368_s9, 1 }
  0x18   : > { %s2384_s14 = scalar_select %p36_p1, %s2278_s29, %s38_s12  }
  0x19   : > { %p2386_p5 = por %p46_p2, %p45_p0  ;;  %p2392_p6 = por %p2880_p4, %p51_p3 }
  0x1a   : > { %2910 = sst [smem:[#allocation23_spill]] %s2384_s14  ;;  %p243_p8 = scmp.eq.s32.totalorder %s1729_s10, 1 }
  0x1b   : > { %s2912_s16 = scalar_select %p2392_p6, 1, 0 }
  0x1c   : > { %p1730_p9 = scmp.ge.s32.totalorder %s2282_s30, 1  ;;  %p250_p10 = scmp.lt.s32.totalorder %s2282_s30, 3 }
  0x1d   : > { %p2399_p11 = por %p237_p7, %p45_p0  ;;  %p2403_p12 = por %p243_p8, %p51_p3 }
  0x1e   : > { %p2407_p13 = pnand %p1730_p9, %p250_p10  ;;  %s2284_s20 = smov [#allocation10]  }
  0x1f   : > { %s2913_s17 = scalar_select %p2399_p11, 1, 0 }
  0x20   : > { %s2915_s18 = scalar_select %p2403_p12, 1, 0 }
  0x21   : > { %2914 = sst [smem:[#allocation24_spill]] %s2913_s17  ;;  %p1931_p1 = pneg %p2407_p13 }
  0x22   : > { %2916 = sst [smem:[#allocation25_spill]] %s2915_s18  ;;  %s262_s21 = sshll.u32 %s2284_s20, 4  ;;  %s263_s21 = int_to_ptr.vmem [resolvable:$true] %s262_s21 }
  0x23   : > { %s2917_s19 = scalar_select %p2407_p13, 1, 0 }
  0x24   : > { %p2415_p2 = pnand %p1931_p1, %p2880_p4  ;;  %p1957_p3 = scmp.lt.s32.totalorder %s2282_s30, 2 }
  0x25   : > { %s2422_s23 = sand.u32 1, %s2278_s29   ;;  %s2049_s25 = scalar_lea.vmem %s263_s21, 256 }
  0x26   : > { %s2918_s22 = scalar_select %p2415_p2, 1, 0 }
  0x27   : > { %p2892_p7 = pneg %p2415_p2  ;;  %p2050_p8 = scmp.ne.s32.totalorder %s263_s21, %s2049_s25 }
  0x28   : > { %p2057_p1 = scmp.lt.s32.totalorder %s263_s21, %s263_s21  ;;  %p2058_p4 = scmp.lt.s32.totalorder %s2049_s25, %s2049_s25 }
  0x29   : > { %p2052_p9 = pnand %p2050_p8, %p2892_p7 }
  0x2a   : > { %p2059_p12 = por %p2058_p4, %p2057_p1 }
  0x2b   : > { %p2053_p10 = pneg %p2052_p9 }
  0x2d   : > { %p2060_p11 = pnand %p2059_p12, %p2053_p10 }
  0x2f   : > { %2063 = shalt.err (!%p2060_p11)
}
  0x30   : > { %s2886_s26 = smov 128   ;;  %s2888_s10 = smov 8  }
  0x31   : > { %s2919_s4 = sld [smem:[#allocation28_spill]]  ;;  %p2442_p4 = pnand %p1957_p3, %p2386_p5 }
  0x32   : > { %s2447_s25 = sshll.u32 %s2282_s30, 7  ;;  %s2890_s24 = sand.u32 1, %s2282_s30  }
  0x33   : > { %s2921_s1 = sld [smem:[#allocation27_spill]]  ;;  %s2922_s18 = sshll.u32 %s2422_s23, 5 }
  0x34   : > { %s319_s15 = scalar_lea.vmem [#allocation5], %s2922_s18  ;;  %s2287_s12 = smov [#allocation11]  }
  0x35   : > { %s2460_s13 = sshll.u32 %s2287_s12, 4  ;;  %p2470_p11 = pneg %p2442_p4  ;;  %s276_s13 = int_to_ptr.vmem [resolvable:$true] %s2460_s13 }
  0x37   : > { %1934 = dma.hbm_to_vmem [thread:$0]  (!%p2415_p2), %s2919_s4, 256, %s263_s21, [#allocation9], %s2886_s26, %s2886_s26, %s2888_s10  }
  0x38   : > { %s325_s21 = sshll.u32 %s319_s15, 4  ;;  %s2464_s26 = scalar_lea.sflag [#allocation6], %s2890_s24  ;;  %s2458_s21 = int_to_ptr.vmem [resolvable:$true] %s325_s21 }
  0x39   : > { %s2454_s11 = scalar_lea.hbm %s2921_s1, %s2447_s25  ;;  %s2069_s15 = scalar_lea.hbm %s2921_s1, 1024 }
  0x3a   : > { %s2064_s10 = scalar_lea.hbm %s2454_s11, 512  ;;  %p2070_p8 = scmp.lt.s32.totalorder %s2454_s11, %s2921_s1 }
  0x3b   : > { %p2065_p5 = scmp.ne.s32.totalorder %s2454_s11, %s2064_s10  ;;  %p2071_p9 = scmp.lt.s32.totalorder %s2069_s15, %s2064_s10 }
  0x3d   : > { %p2067_p12 = pnand %p2470_p11, %p2065_p5  ;;  %p2072_p10 = por %p2071_p9, %p2070_p8 }
  0x3f   : > { %p2068_p3 = pneg %p2067_p12 }
  0x41   : > { %p2073_p1 = pnand %p2072_p10, %p2068_p3 }
  0x43   : > { %2076 = shalt.err (!%p2073_p1)
}
  0x44   : > { %s2077_s24 = scalar_lea.vmem %s2458_s21, 512  ;;  %s2288_s27 = smov [#allocation5]  }
  0x45   : > { %p2078_p0 = scmp.ne.s32.totalorder %s2458_s21, %s2077_s24  ;;  %s2082_s14 = sshll.u32 %s2288_s27, 4  ;;  %s2083_s14 = int_to_ptr.vmem [resolvable:$false] %s2082_s14 }
  0x46   : > { %s2084_s18 = scalar_lea.vmem %s2083_s14, 1024  ;;  %p2085_p7 = scmp.lt.s32.totalorder %s2458_s21, %s2083_s14 }
  0x47   : > { %p2080_p5 = pnand %p2078_p0, %p2470_p11  ;;  %p2086_p6 = scmp.lt.s32.totalorder %s2084_s18, %s2077_s24 }
  0x49   : > { %p2081_p12 = pneg %p2080_p5  ;;  %p2087_p13 = por %p2086_p6, %p2085_p7 }
  0x4b   : > { %p2088_p2 = pnand %p2087_p13, %p2081_p12 }
  0x4d   : > { %2091 = shalt.err (!%p2088_p2)
}
  0x4e   : > { %s2897_s4 = smov 256   ;;  %s2924_s10 = smov 8  }
  0x4f   : > { %s2925_s15 = smov 128   ;;  %s2103_s27 = scalar_lea.vmem %s276_s13, 512 }
  0x50   : > { %1944 = dma.hbm_to_vmem [thread:$0]  (!%p2442_p4), %s2454_s11, 512, %s2458_s21, %s2464_s26, %s2897_s4, %s2925_s15, %s2924_s10  }
  0x51   : > { %p2104_p0 = scmp.ne.s32.totalorder %s276_s13, %s2103_s27  ;;  %p2926_p3 = scmp.ne.s32.totalorder %s2918_s22, 0 }
  0x52   : > { %p2111_p2 = scmp.lt.s32.totalorder %s276_s13, %s276_s13  ;;  %p2112_p7 = scmp.lt.s32.totalorder %s2103_s27, %s2103_s27 }
  0x53   : > { %p2927_p8 = pneg %p2926_p3 }
  0x54   : > { %p2113_p9 = por %p2112_p7, %p2111_p2 }
  0x55   : > { %p2106_p6 = pnand %p2104_p0, %p2927_p8 }
  0x57   : > { %p2107_p13 = pneg %p2106_p6 }
  0x59   : > { %p2114_p10 = pnand %p2113_p9, %p2107_p13 }
  0x5b   : > { %2117 = shalt.err (!%p2114_p10)
}
  0x5c   : > { %s2928_s5 = sld [smem:[#allocation29_spill]]  ;;  %s2930_s18 = sshll.u32 %s2422_s23, 5 }
  0x5d   : > { %s2929_s0 = sld [smem:[#allocation26_spill]]  ;;  %s299_s22 = scalar_lea.vmem [#allocation2], %s2930_s18 }
  0x5e   : > { %s305_s27 = sshll.u32 %s299_s22, 4  ;;  %s1738_s4 = sshll.u32 %s2422_s23, 3  ;;  %s2517_s27 = int_to_ptr.vmem [resolvable:$true] %s305_s27 }
  0x5f   : > { %s296_s24 = scalar_lea.sflag [#allocation3], %s2422_s23 }
  0x62   : > { %1937 = dma.hbm_to_vmem [thread:$0]  (!%p2926_p3), %s2928_s5, 512, %s276_s13, [#allocation12], %s2925_s15, %s2925_s15, %s2924_s10  }
  0x63   : > { %s2512_s14 = scalar_lea.hbm %s2929_s0, %s2447_s25  ;;  %s2123_s11 = scalar_lea.hbm %s2929_s0, 1024 }
  0x64   : > { %s2118_s12 = scalar_lea.hbm %s2512_s14, 512  ;;  %p2124_p0 = scmp.lt.s32.totalorder %s2512_s14, %s2929_s0 }
  0x65   : > { %p2119_p1 = scmp.ne.s32.totalorder %s2512_s14, %s2118_s12  ;;  %p2125_p3 = scmp.lt.s32.totalorder %s2123_s11, %s2118_s12 }
  0x67   : > { %p2121_p5 = pnand %p2119_p1, %p2470_p11  ;;  %p2126_p8 = por %p2125_p3, %p2124_p0 }
  0x69   : > { %p2122_p12 = pneg %p2121_p5 }
  0x6b   : > { %p2127_p6 = pnand %p2126_p8, %p2122_p12 }
  0x6d   : > { %2130 = shalt.err (!%p2127_p6)
}
  0x6e   : > { %s2131_s18 = scalar_lea.vmem %s2517_s27, 512  ;;  %s2290_s22 = smov [#allocation2]  }
  0x6f   : > { %p2132_p13 = scmp.ne.s32.totalorder %s2517_s27, %s2131_s18  ;;  %s2136_s1 = sshll.u32 %s2290_s22, 4  ;;  %s2137_s1 = int_to_ptr.vmem [resolvable:$false] %s2136_s1 }
  0x70   : > { %s2138_s13 = scalar_lea.vmem %s2137_s1, 1024  ;;  %p2139_p9 = scmp.lt.s32.totalorder %s2517_s27, %s2137_s1 }
  0x71   : > { %p2134_p2 = pnand %p2132_p13, %p2470_p11  ;;  %p2140_p10 = scmp.lt.s32.totalorder %s2138_s13, %s2131_s18 }
  0x73   : > { %p2135_p7 = pneg %p2134_p2  ;;  %p2141_p1 = por %p2140_p10, %p2139_p9 }
  0x75   : > { %p2142_p5 = pnand %p2141_p1, %p2135_p7 }
  0x77   : > { %2145 = shalt.err (!%p2142_p5)
}
  0x78   : > { %s2931_s5 = smov 256   ;;  %s344_s21 = scalar_lea.hbm %s2873_s2, %s2447_s25 }
  0x79   : > { %1941 = dma.hbm_to_vmem [thread:$0]  (!%p2442_p4), %s2512_s14, 512, %s2517_s27, %s296_s24, %s2931_s5, %s2925_s15, %s2924_s10  }
  0x7a   : > { %s339_s18 = scalar_lea.vmem [#allocation7], %s1738_s4  ;;  %s2146_s1 = scalar_lea.hbm %s344_s21, 128 }
  0x7b   : > { %s346_s22 = sshll.u32 %s339_s18, 4  ;;  %p2147_p12 = scmp.ne.s32.totalorder %s344_s21, %s2146_s1  ;;  %s347_s22 = int_to_ptr.vmem [resolvable:$true] %s346_s22 }
  0x7c   : > { %s2151_s8 = scalar_lea.hbm %s2873_s2, 256  ;;  %p2152_p8 = scmp.lt.s32.totalorder %s344_s21, %s2873_s2 }
  0x7d   : > { %p2149_p0 = pnand %p2147_p12, %p2470_p11  ;;  %p2153_p6 = scmp.lt.s32.totalorder %s2151_s8, %s2146_s1 }
  0x7f   : > { %p2150_p3 = pneg %p2149_p0  ;;  %p2154_p13 = por %p2153_p6, %p2152_p8 }
  0x81   : > { %p2155_p2 = pnand %p2154_p13, %p2150_p3 }
  0x83   : > { %2158 = shalt.err (!%p2155_p2)
}
  0x84   : > { %s2159_s10 = scalar_lea.vmem %s347_s22, 128  ;;  %s2291_s15 = smov [#allocation7]  }
  0x85   : > { %p2160_p7 = scmp.ne.s32.totalorder %s347_s22, %s2159_s10  ;;  %s2164_s14 = sshll.u32 %s2291_s15, 4  ;;  %s2165_s14 = int_to_ptr.vmem [resolvable:$false] %s2164_s14 }
  0x86   : > { %s2166_s27 = scalar_lea.vmem %s2165_s14, 256  ;;  %p2167_p1 = scmp.lt.s32.totalorder %s347_s22, %s2165_s14 }
  0x87   : > { %p2162_p9 = pnand %p2160_p7, %p2470_p11  ;;  %p2168_p5 = scmp.lt.s32.totalorder %s2166_s27, %s2159_s10 }
  0x89   : > { %p2163_p10 = pneg %p2162_p9  ;;  %p2169_p12 = por %p2168_p5, %p2167_p1 }
  0x8b   : > { %p2170_p0 = pnand %p2169_p12, %p2163_p10 }
  0x8d   : > { %2173 = shalt.err (!%p2170_p0)
}
  0x8e   : > { %1947 = dma.hbm_to_vmem [thread:$0]  (!%p2442_p4), %s344_s21, 128, %s347_s22, %s2464_s26  }
  0x8f   : > { %s2566_s8 = scalar_lea.hbm %s2874_s3, %s2447_s25  ;;  %s357_s17 = scalar_lea.vmem [#allocation8], %s1738_s4 }
  0x90   : > { %s364_s24 = sshll.u32 %s357_s17, 4  ;;  %s2932_s5 = sand.u32 1, %s2282_s30   ;;  %s365_s24 = int_to_ptr.vmem [resolvable:$true] %s364_s24 }
  0x91   : > { %s354_s12 = scalar_lea.sflag [#allocation9], %s2932_s5  ;;  %s2174_s11 = scalar_lea.hbm %s2566_s8, 128 }
  0x92   : > { %p2175_p3 = scmp.ne.s32.totalorder %s2566_s8, %s2174_s11  ;;  %s2179_s18 = scalar_lea.hbm %s2874_s3, 256 }
  0x93   : > { %p2180_p13 = scmp.lt.s32.totalorder %s2566_s8, %s2874_s3  ;;  %p2181_p2 = scmp.lt.s32.totalorder %s2179_s18, %s2174_s11 }
  0x94   : > { %p2177_p8 = pnand %p2175_p3, %p2470_p11 }
  0x95   : > { %p2182_p7 = por %p2181_p2, %p2180_p13 }
  0x96   : > { %p2178_p6 = pneg %p2177_p8 }
  0x98   : > { %p2183_p9 = pnand %p2182_p7, %p2178_p6 }
  0x9a   : > { %2186 = shalt.err (!%p2183_p9)
}
  0x9b   : > { %s2187_s23 = scalar_lea.vmem %s365_s24, 128  ;;  %s2292_s4 = smov [#allocation8]  }
  0x9c   : > { %p2188_p10 = scmp.ne.s32.totalorder %s365_s24, %s2187_s23  ;;  %s2192_s1 = sshll.u32 %s2292_s4, 4  ;;  %s2193_s1 = int_to_ptr.vmem [resolvable:$false] %s2192_s1 }
  0x9d   : > { %s2194_s13 = scalar_lea.vmem %s2193_s1, 256  ;;  %p2195_p12 = scmp.lt.s32.totalorder %s365_s24, %s2193_s1 }
  0x9e   : > { %p2190_p1 = pnand %p2188_p10, %p2470_p11  ;;  %p2196_p0 = scmp.lt.s32.totalorder %s2194_s13, %s2187_s23 }
  0xa0   : > { %p2191_p5 = pneg %p2190_p1  ;;  %p2197_p3 = por %p2196_p0, %p2195_p12 }
  0xa2   : > { %p2198_p8 = pnand %p2197_p3, %p2191_p5 }
  0xa4   : > { %2201 = shalt.err (!%p2198_p8)
}
  0xa5   : > { %1950 = dma.hbm_to_vmem [thread:$0]  (!%p2442_p4), %s2566_s8, 128, %s365_s24, %s354_s12  }
  0xa6   : > { %p2933_p6 = scmp.ne.s32.totalorder %s2917_s19, 0 }
  0xa7   : > { %s2591_s29 = sand.u32 (!%p2933_p6), 1, %s2274_s28   ;;  %p2934_p11 = scmp.ne.s32.totalorder (!%p2933_p6), %s2912_s16, 0 }
  0xa8   : > { %373 = sbr.rel (%p2933_p6) target bundleno = 2623 (0xa3f), region = 52  ;;  %s2594_s10 = sshll.u32 (!%p2933_p6), %s2591_s29, 5 }
  0xa9   : > { %s376_s15 = scalar_lea.sflag (!%p2933_p6), [#allocation3], %s2591_s29  ;;  %s2598_s14 = scalar_lea.vmem (!%p2933_p6), [#allocation2], %s2594_s10 }
  0xad   : > { %2245 = dma.done.wait (%p2934_p11), %s376_s15, 512  }
  0xae   : > { %2247 = vsyncadd (%p2934_p11), %s376_s15, 4294966784  ;;  %s384_s19 = sand.u32 1, %s2368_s9   ;;  %s2606_s27 = scalar_lea.vmem [#allocation5], %s2594_s10 }
  0xaf   : > { %s385_s20 = scalar_lea.sflag [#allocation6], %s384_s19 }
  0xb0   : > { %2249 = dma.done.wait (%p2934_p11), %s385_s20, 640  }
  0xb1   : > { %2251 = vsyncadd (%p2934_p11), %s385_s20, 4294966656  ;;  %s1745_s0 = sshll.u32 %s2591_s29, 3  ;;  %s403_s8 = scalar_lea.sflag [#allocation9], %s384_s19 }
  0xb2   : > { %s2613_s6 = scalar_lea.vmem [#allocation7], %s1745_s0  ;;  %s2615_s17 = scalar_lea.vmem [#allocation8], %s1745_s0 }
  0xb3   : > { %2253 = dma.done.wait (%p2934_p11), %s403_s8, 128  }
  0xb4   : > { %2255 = vsyncadd (%p2934_p11), %s403_s8, 4294967168  ;;  %p2935_p4 = scmp.eq.s32.totalorder %s2368_s9, 0 }
  0xb6   : > { %2257 = dma.done.wait (%p2935_p4), [#allocation9], 256   ;;  %p2936_p13 = pmov %p2935_p4 }
  0xb7   : > { %p2937_p2 = pmov %p2935_p4 }
  0xb8   : > { %2259 = vsyncadd (%p2936_p13), [#allocation9], 4294967040 }
  0xb9   : > { %2261 = dma.done.wait (%p2937_p2), [#allocation12], 512   ;;  %p2938_p7 = pmov %p2937_p2 }
  0xba   : > { %v2293_v0 = vmov 0.0   ;;  %vm2294_vm0 = vmmov 0   ;;  %vm474_vm1 = vcmask 64512   ;;  %v472_v1 = vld [vmem:[%s2598_s14] sm:$0xff]  ;;  %v2641_v3 = vld [vmem:[#allocation11 + $0x18] sm:$0xff]  ;;  %v2649_v6 = vld [vmem:[#allocation11 + $0x8] sm:$0xff] }
  0xbb   : > { %2263 = vsyncadd (%p2938_p7), [#allocation12], 4294966784  ;;  %1821 = vmatprep.subr.mxu0 %v2293_v0  ;;  %1823 = vmatprep.mubr.msk.f32.mxu0 %vm2294_vm0, %v2293_v0  ;;  %v473_v2 = vld [vmem:[%s2606_s27] sm:$0xff]  ;;  %v2646_v5 = vld [vmem:[#allocation10 + $0x8] sm:$0xff]  ;;  %vm553_vm2 = vcmask 261120   ;;  %s2295_s5 = smov 96  }
  0xbc   : > { %1826 = vmatprep.subr.mxu1 %v2293_v0  ;;  %1834 = vmatprep.mubr.msk.f32.mxu1 %vm2294_vm0, %v2293_v0  ;;  %v2643_v4 = vld [vmem:[#allocation11 + $0x10] sm:$0xff]  ;;  %v2655_v7 = vld [vmem:[#allocation11] sm:$0xff]  ;;  %s2296_s12 = smov 8   ;;  %s2297_s11 = smov 32   ;;  %vm627_vm3 = vcmask 130048   ;;  %v1756_v17 = vld [vmem:[%s2598_s14 + $0x8] sm:$0xff] }
  0xbd   : > { %1822 = vmatpush3.msra.mxu0 %v472_v1  ;;  %1827 = vmatpush3.msra.mxu1 %v2641_v3  ;;  %v470_v8 = vld [vmem:[%s2613_s6] sm:$0xff]  ;;  %s2939_s18 = sld [smem:[#allocation30_spill]]  ;;  %s2298_s25 = smov 64   ;;  %v471_v43 = vld [vmem:[%s2615_s17] sm:$0xff] }
  0xbe   : > { %1824 = vmatmul.mubr.msk.f32.vlgmr.msra.gmra.mxu0 %vm474_vm1, %v473_v2  ;;  %1837 = vmatprep.subr.mxu0 %v2293_v0  ;;  %v2663_v9 = vld [vmem:[#allocation10] sm:$0xff]  ;;  %v1757_v18 = vld [vmem:[%s2606_s27 + $0x8] sm:$0xff]  ;;  %s2730_s22 = scalar_lea.vmem [#allocation13], %s2594_s10  ;;  %v1763_v53 = vld [vmem:[%s2598_s14 + $0x10] sm:$0xff]  ;;  %s2940_s23 = sld [smem:[#allocation24_spill]] }
  0xbf   : > { %1841 = vmatprep.mubr.msk.f32.mxu0 %vm2294_vm0, %v2293_v0  ;;  %1828 = vmatprep.subr.mxu1 %v2293_v0  ;;  %v2670_v10 = vld [vmem:[%s2878_s7] ss:$0 sm:$0xff]  ;;  %v1764_v54 = vld [vmem:[%s2606_s27 + $0x10] sm:$0xff]  ;;  %s1571_s4 = sshll.u32 %s2730_s22, 4  ;;  %s1778_s1 = sshll.u32 %s2368_s9, 7  ;;  %s2820_s4 = int_to_ptr.vmem [resolvable:$true] %s1571_s4 }
  0xc0   : > { %1838 = vmatpush3.msra.mxu0 %v2646_v5  ;;  %1829 = vmatpush3.msra.mxu1 %v2643_v4  ;;  %s2941_s15 = sld [smem:[#allocation31_spill]]  ;;  %s1559_s19 = scalar_lea.sflag [#allocation4], %s2591_s29 }
  0xc1   : > { %1839 = vmatprep.subr.mxu0 %v2293_v0  ;;  %1830 = vmatprep.subr.mxu1 %v2293_v0  ;;  %s2202_s20 = scalar_lea.vmem %s2820_s4, 512  ;;  %s2299_s9 = smov [#allocation13]  }
  0xc2   : > { %1831 = vmatpush3.msra.mxu1 %v2649_v6  ;;  %1840 = vmatpush3.msra.mxu0 %v2663_v9  ;;  %p2203_p9 = scmp.ne.s32.totalorder %s2820_s4, %s2202_s20 }
  0xc3   : > { %1832 = vmatprep.subr.mxu1 %v2293_v0  ;;  %1844 = vmatprep.subr.mxu0 %v2293_v0  ;;  %v2704_v19 = vld [vmem:[%s2939_s18] ss:$0 sm:$0xff] }
  0xc4   : > { %1833 = vmatpush3.msra.mxu1 %v2655_v7  ;;  %736 = vrot.lane.b32.xlu1 %v2670_v10, %s2295_s5  ;;  %p2942_p10 = scmp.ne.s32.totalorder %s2940_s23, 0 }
  0xc5   : > { %1849 = vmatprep.subr.mxu1 %v2293_v0  ;;  %1835 = vmatmul.mubr.msk.f32.vlgmr.msra.gmra.mxu1 %vm553_vm2, %v470_v8 }
  0xc6   : > { %1850 = vmatpush3.msra.mxu1 %v2641_v3  ;;  %1857 = vmatprep.mubr.msk.f32.mxu1 %vm2294_vm0, %v2293_v0  ;;  %p2204_p1 = pnand %p2203_p9, %p2942_p10 }
  0xc7   : > { %1851 = vmatprep.subr.mxu1 %v2293_v0 }
  0xc8   : > { %1852 = vmatpush3.msra.mxu1 %v2643_v4  ;;  %p2205_p5 = pneg %p2204_p1 }
  0xc9   : > { %1853 = vmatprep.subr.mxu1 %v2293_v0 }
  0xca   : > { %1854 = vmatpush3.msra.mxu1 %v2649_v6 }
  0xcb   : > { %1855 = vmatprep.subr.mxu1 %v2293_v0 }
  0xcc   : > { %1856 = vmatpush3.msra.mxu1 %v2655_v7 }
  0xcd   : > { %1872 = vmatprep.subr.mxu1 %v2293_v0 }
 0x136   : > { %v2711_v31 = vpop.permute.xlu1 %736 }
 0x17e   : > { %v544_v11 = vpop.f32.mrf.mxu0 }
 0x17f   : > { %549 = vrot.lane.b32.xlu0 %v544_v11, %s2296_s12 }
 0x180   : > { %v1825_v12 = vpop.f32.mrf.mxu0 }
 0x183   : > { %725 = vrot.lane.b32.xlu0 %v2670_v10, %s2297_s11 }
 0x185   : > { %v623_v15 = vpop.f32.mrf.mxu1 }
 0x187   : > { %v1836_v16 = vpop.f32.mrf.mxu1 }
 0x1f1   : > { %v550_v13 = vpop.permute.xlu0 %549 }
 0x1f2   : > { %v552_v14 = vsel %vm474_vm1, %v472_v1, %v550_v13 }
 0x1f3   : > { %1842 = vmatmul.mubr.msk.f32.vlgmr.msra.gmra.mxu0 %vm627_vm3, %v552_v14 }
 0x1f4   : > { %1846 = vmatprep.mubr.msk.f32.mxu0 %vm2294_vm0, %v2293_v0  ;;  %1845 = vmatpush3.msra.mxu0 %v1756_v17 }
 0x1f5   : > { %1860 = vmatprep.subr.mxu0 %v2293_v0  ;;  %v2707_v27 = vpop.permute.xlu0 %725 }
 0x1f7   : > { %1847 = vmatmul.mubr.msk.f32.vlgmr.msra.gmra.mxu0 %vm474_vm1, %v1757_v18 }
 0x1f8   : > { %1861 = vmatpush3.msra.mxu0 %v2646_v5  ;;  %1864 = vmatprep.mubr.msk.f32.mxu0 %vm2294_vm0, %v2293_v0 }
 0x1f9   : > { %1862 = vmatprep.subr.mxu0 %v2293_v0 }
 0x1fa   : > { %1863 = vmatpush3.msra.mxu0 %v2663_v9 }
 0x1fb   : > { %1867 = vmatprep.subr.mxu0 %v2293_v0 }
 0x2b3   : > { %v697_v20 = vpop.f32.mrf.mxu0 }
 0x2b4   : > { %v698_v21 = vadd.f32 %v697_v20, %v623_v15 }
 0x2b5   : > { %v1843_v22 = vpop.f32.mrf.mxu0 }
 0x2b6   : > { %v707_v23 = vadd.f32 %v2704_v19, %v698_v21 }
 0x2b7   : > { %v830_v34 = vpop.f32.mrf.mxu0 }
 0x2b8   : > { %v1754_v24 = vmul.f32 -1.442695, %v707_v23 }
 0x2b9   : > { %v1848_v35 = vpop.f32.mrf.mxu0 }
 0x2ba   : > { %2006 = vpow2.f32 %v1754_v24  ;;  %v1771_v35 = vld [vmem:[%s2606_s27 + $0x18] sm:$0xff]  ;;  %s2206_s27 = sshll.u32 %s2299_s9, 4  ;;  %s2207_s27 = int_to_ptr.vmem [resolvable:$false] %s2206_s27 }
 0x2bb   : > { %s2208_s0 = scalar_lea.vmem %s2207_s27, 1024  ;;  %p2209_p12 = scmp.lt.s32.totalorder %s2820_s4, %s2207_s27 }
 0x2bc   : > { %p2210_p0 = scmp.lt.s32.totalorder %s2208_s0, %s2202_s20 }
 0x2be   : > { %p2211_p3 = por %p2210_p0, %p2209_p12 }
 0x2c0   : > { %p2212_p8 = pnand %p2211_p3, %p2205_p5 }
 0x2c7   : > { %v2007_v25 = vpop.eup %2006 }
 0x2c8   : > { %v711_v26 = vadd.f32 1.0, %v2007_v25 }
 0x2ca   : > { %2008 = vrcp.f32 %v711_v26 }
 0x2cb   : > { %2010 = vtanh.f32 %v707_v23 }
 0x2d7   : > { %v2009_v28 = vpop.eup %2008 }
 0x2d8   : > { %v728_v29 = vmul.f32 %v2009_v28, %v2707_v27  ;;  %v721_v30 = vmul.f32 %v2009_v28, %v2670_v10  ;;  %v739_v33 = vmul.f32 %v2009_v28, %v2711_v31  ;;  %v2011_v40 = vpop.eup %2010 }
 0x2da   : > { %730 = vrot.lane.b32.xlu1 %v728_v29, %s2295_s5  ;;  %v722_v32 = vsel %vm553_vm2, %v721_v30, 0.0 }
 0x2db   : > { %723 = vadd.xlane.f32.xlu0 %v722_v32 }
 0x2de   : > { %741 = vrot.lane.b32.xlu1 %v739_v33, %s2297_s11 }
 0x34c   : > { %v731_v36 = vpop.permute.xlu1 %730 }
 0x34d   : > { %v733_v37 = vsel %vm553_vm2, %v731_v36, 0.0 }
 0x34e   : > { %734 = vadd.xlane.f32.xlu1 %v733_v37 }
 0x350   : > { %v742_v38 = vpop.permute.xlu1 %741 }
 0x351   : > { %v744_v39 = vsel %vm553_vm2, %v742_v38, 0.0 }
 0x352   : > { %745 = vadd.xlane.f32.xlu1 %v744_v39 }
 0x363   : > { %835 = vrot.lane.b32.xlu1 %v830_v34, %s2296_s12  ;;  %v1770_v34 = vld [vmem:[%s2598_s14 + $0x18] sm:$0xff]  ;;  %s2825_s14 = scalar_lea.hbm %s2941_s15, %s1778_s1 }
 0x364   : > { %v724_v41 = vpop.xlane.xlu0 %723 }
 0x365   : > { %v748_v42 = vmul.f32 %v2011_v40, %v724_v41 }
 0x367   : > { %750 = vrot.lane.b32.xlu0 %v748_v42, %s2298_s25 }
 0x3d7   : > { %v735_v44 = vpop.xlane.xlu1 %734 }
 0x3d8   : > { %v747_v45 = vmul.f32 %v735_v44, %v471_v43 }
 0x3d9   : > { %v751_v46 = vpop.permute.xlu0 %750 }
 0x3da   : > { %v2722_v47 = vadd.f32 %v751_v46, %v747_v45 }
 0x3db   : > { %v746_v48 = vpop.xlane.xlu1 %745 }
 0x3dc   : > { %2012 = vtanh.f32 %v2722_v47 }
 0x3df   : > { %v836_v49 = vpop.permute.xlu1 %835 }
 0x3e0   : > { %v838_v50 = vsel %vm474_vm1, %v1756_v17, %v836_v49 }
 0x3e1   : > { %1865 = vmatmul.mubr.msk.f32.vlgmr.msra.gmra.mxu0 %vm627_vm3, %v838_v50 }
 0x3e2   : > { %1869 = vmatprep.mubr.msk.f32.mxu0 %vm2294_vm0, %v2293_v0  ;;  %1868 = vmatpush3.msra.mxu0 %v1763_v53 }
 0x3e3   : > { %1883 = vmatprep.subr.mxu0 %v2293_v0 }
 0x3e5   : > { %1870 = vmatmul.mubr.msk.f32.vlgmr.msra.gmra.mxu0 %vm474_vm1, %v1764_v54 }
 0x3e6   : > { %1884 = vmatpush3.msra.mxu0 %v2646_v5  ;;  %1887 = vmatprep.mubr.msk.f32.mxu0 %vm2294_vm0, %v2293_v0 }
 0x3e7   : > { %1885 = vmatprep.subr.mxu0 %v2293_v0 }
 0x3e8   : > { %1886 = vmatpush3.msra.mxu0 %v2663_v9 }
 0x3e9   : > { %v2013_v51 = vpop.eup %2012  ;;  %1890 = vmatprep.subr.mxu0 %v2293_v0 }
 0x3ea   : > { %v755_v52 = vmul.f32 %v2013_v51, %v746_v48 }
 0x3ec   : > { %756 = vst.msk [vmem:[%s2730_s22] sm:$0xff] %vm553_vm2, %v755_v52  ;;  %1858 = vmatmul.mubr.msk.f32.vlgmr.msra.gmra.mxu1 %vm553_vm2, %v755_v52 }
 0x3ed   : > { %1873 = vmatpush3.msra.mxu1 %v2641_v3  ;;  %1880 = vmatprep.mubr.msk.f32.mxu1 %vm2294_vm0, %v2293_v0 }
 0x3ee   : > { %1874 = vmatprep.subr.mxu1 %v2293_v0 }
 0x3ef   : > { %1875 = vmatpush3.msra.mxu1 %v2643_v4 }
 0x3f0   : > { %1876 = vmatprep.subr.mxu1 %v2293_v0 }
 0x3f1   : > { %1877 = vmatpush3.msra.mxu1 %v2649_v6 }
 0x3f2   : > { %1878 = vmatprep.subr.mxu1 %v2293_v0 }
 0x3f3   : > { %1879 = vmatpush3.msra.mxu1 %v2655_v7 }
 0x3f4   : > { %1895 = vmatprep.subr.mxu1 %v2293_v0 }
 0x4a1   : > { %v981_v55 = vpop.f32.mrf.mxu0 }
 0x4a3   : > { %v1866_v56 = vpop.f32.mrf.mxu0 }
 0x4a5   : > { %v1097_v13 = vpop.f32.mrf.mxu0 }
 0x4a7   : > { %v1871_v14 = vpop.f32.mrf.mxu0 }
 0x4ac   : > { %v908_v57 = vpop.f32.mrf.mxu1 }
 0x4ad   : > { %v982_v58 = vadd.f32 %v981_v55, %v908_v57 }
 0x4ae   : > { %v1859_v59 = vpop.f32.mrf.mxu1 }
 0x4af   : > { %v985_v60 = vadd.f32 %v2704_v19, %v982_v58 }
 0x4b1   : > { %v1761_v61 = vmul.f32 -1.442695, %v985_v60 }
 0x4b3   : > { %2014 = vpow2.f32 %v1761_v61 }
 0x4c0   : > { %v2015_v62 = vpop.eup %2014 }
 0x4c1   : > { %v989_v63 = vadd.f32 1.0, %v2015_v62 }
 0x4c3   : > { %2016 = vrcp.f32 %v989_v63 }
 0x4c4   : > { %2018 = vtanh.f32 %v985_v60 }
 0x4d0   : > { %v2017_v1 = vpop.eup %2016 }
 0x4d1   : > { %v1005_v2 = vmul.f32 %v2017_v1, %v2711_v31  ;;  %v997_v8 = vmul.f32 %v2017_v1, %v2707_v27  ;;  %v993_v11 = vmul.f32 %v2017_v1, %v2670_v10  ;;  %v2019_v20 = vpop.eup %2018 }
 0x4d3   : > { %1007 = vrot.lane.b32.xlu1 %v1005_v2, %s2297_s11  ;;  %999 = vrot.lane.b32.xlu0 %v997_v8, %s2295_s5  ;;  %v994_v12 = vsel %vm553_vm2, %v993_v11, 0.0 }
 0x4f2   : > { %995 = vadd.xlane.f32.xlu0 %v994_v12 }
 0x545   : > { %v1000_v15 = vpop.permute.xlu0 %999  ;;  %v1008_v17 = vpop.permute.xlu1 %1007 }
 0x546   : > { %v1002_v16 = vsel %vm553_vm2, %v1000_v15, 0.0  ;;  %v1010_v18 = vsel %vm553_vm2, %v1008_v17, 0.0 }
 0x547   : > { %1003 = vadd.xlane.f32.xlu1 %v1002_v16 }
 0x54b   : > { %1011 = vadd.xlane.f32.xlu1 %v1010_v18 }
 0x55c   : > { %1102 = vrot.lane.b32.xlu1 %v1097_v13, %s2296_s12 }
 0x57b   : > { %v996_v21 = vpop.xlane.xlu0 %995 }
 0x57c   : > { %v1014_v22 = vmul.f32 %v2019_v20, %v996_v21 }
 0x57e   : > { %1016 = vrot.lane.b32.xlu0 %v1014_v22, %s2298_s25 }
 0x5d0   : > { %v1004_v23 = vpop.xlane.xlu1 %1003 }
 0x5d1   : > { %v1013_v28 = vmul.f32 %v1004_v23, %v2722_v47 }
 0x5d4   : > { %v1012_v24 = vpop.xlane.xlu1 %1011 }
 0x5d8   : > { %v1103_v25 = vpop.permute.xlu1 %1102 }
 0x5d9   : > { %v1105_v26 = vsel %vm474_vm1, %v1763_v53, %v1103_v25 }
 0x5da   : > { %1888 = vmatmul.mubr.msk.f32.vlgmr.msra.gmra.mxu0 %vm627_vm3, %v1105_v26 }
 0x5db   : > { %1892 = vmatprep.mubr.msk.f32.mxu0 %vm2294_vm0, %v2293_v0  ;;  %1891 = vmatpush3.msra.mxu0 %v1770_v34 }
 0x5dc   : > { %1906 = vmatprep.subr.mxu0 %v2293_v0 }
 0x5de   : > { %1893 = vmatmul.mubr.msk.f32.vlgmr.msra.gmra.mxu0 %vm474_vm1, %v1771_v35 }
 0x5df   : > { %1907 = vmatpush3.msra.mxu0 %v2646_v5  ;;  %1910 = vmatprep.mubr.msk.f32.mxu0 %vm2294_vm0, %v2293_v0 }
 0x5e0   : > { %1908 = vmatprep.subr.mxu0 %v2293_v0 }
 0x5e1   : > { %1909 = vmatpush3.msra.mxu0 %v2663_v9 }
 0x5f0   : > { %v1017_v29 = vpop.permute.xlu0 %1016 }
 0x5f1   : > { %v1019_v30 = vadd.f32 %v1017_v29, %v1013_v28 }
 0x5f3   : > { %2020 = vtanh.f32 %v1019_v30 }
 0x600   : > { %v2021_v32 = vpop.eup %2020 }
 0x601   : > { %v1021_v33 = vmul.f32 %v2021_v32, %v1012_v24 }
 0x603   : > { %1762 = vst.msk [vmem:[%s2730_s22 + $0x8] sm:$0xff] %vm553_vm2, %v1021_v33  ;;  %1881 = vmatmul.mubr.msk.f32.vlgmr.msra.gmra.mxu1 %vm553_vm2, %v1021_v33 }
 0x604   : > { %1896 = vmatpush3.msra.mxu1 %v2641_v3  ;;  %1903 = vmatprep.mubr.msk.f32.mxu1 %vm2294_vm0, %v2293_v0 }
 0x605   : > { %1897 = vmatprep.subr.mxu1 %v2293_v0 }
 0x606   : > { %1898 = vmatpush3.msra.mxu1 %v2643_v4 }
 0x607   : > { %1899 = vmatprep.subr.mxu1 %v2293_v0 }
 0x608   : > { %1900 = vmatpush3.msra.mxu1 %v2649_v6 }
 0x609   : > { %1901 = vmatprep.subr.mxu1 %v2293_v0 }
 0x60a   : > { %1902 = vmatpush3.msra.mxu1 %v2655_v7 }
 0x69a   : > { %v1248_v3 = vpop.f32.mrf.mxu0 }
 0x69c   : > { %v1889_v4 = vpop.f32.mrf.mxu0 }
 0x69e   : > { %v1364_v43 = vpop.f32.mrf.mxu0 }
 0x6a0   : > { %v1894_v44 = vpop.f32.mrf.mxu0 }
 0x6c3   : > { %v1175_v6 = vpop.f32.mrf.mxu1 }
 0x6c4   : > { %v1249_v7 = vadd.f32 %v1248_v3, %v1175_v6 }
 0x6c5   : > { %v1882_v36 = vpop.f32.mrf.mxu1 }
 0x6c6   : > { %v1252_v37 = vadd.f32 %v2704_v19, %v1249_v7 }
 0x6c8   : > { %v1768_v38 = vmul.f32 -1.442695, %v1252_v37 }
 0x6ca   : > { %2022 = vpow2.f32 %v1768_v38 }
 0x6d7   : > { %v2023_v39 = vpop.eup %2022 }
 0x6d8   : > { %v1256_v40 = vadd.f32 1.0, %v2023_v39 }
 0x6da   : > { %2024 = vrcp.f32 %v1256_v40 }
 0x6db   : > { %2026 = vtanh.f32 %v1252_v37 }
 0x6e7   : > { %v2025_v5 = vpop.eup %2024 }
 0x6e8   : > { %v1272_v41 = vmul.f32 %v2025_v5, %v2711_v31  ;;  %v1264_v42 = vmul.f32 %v2025_v5, %v2707_v27  ;;  %v1260_v0 = vmul.f32 %v2025_v5, %v2670_v10  ;;  %v2027_v49 = vpop.eup %2026 }
 0x6ea   : > { %1274 = vrot.lane.b32.xlu1 %v1272_v41, %s2297_s11  ;;  %1266 = vrot.lane.b32.xlu0 %v1264_v42, %s2295_s5  ;;  %v1261_v9 = vsel %vm553_vm2, %v1260_v0, 0.0 }
 0x709   : > { %1262 = vadd.xlane.f32.xlu0 %v1261_v9 }
 0x75c   : > { %v1267_v45 = vpop.permute.xlu0 %1266  ;;  %v1275_v47 = vpop.permute.xlu1 %1274 }
 0x75d   : > { %v1269_v46 = vsel %vm553_vm2, %v1267_v45, 0.0  ;;  %v1277_v48 = vsel %vm553_vm2, %v1275_v47, 0.0 }
 0x75e   : > { %1270 = vadd.xlane.f32.xlu1 %v1269_v46 }
 0x762   : > { %1278 = vadd.xlane.f32.xlu1 %v1277_v48 }
 0x773   : > { %1369 = vrot.lane.b32.xlu1 %v1364_v43, %s2296_s12 }
 0x792   : > { %v1263_v50 = vpop.xlane.xlu0 %1262 }
 0x793   : > { %v1281_v51 = vmul.f32 %v2027_v49, %v1263_v50 }
 0x795   : > { %1283 = vrot.lane.b32.xlu0 %v1281_v51, %s2298_s25 }
 0x7e7   : > { %v1271_v52 = vpop.xlane.xlu1 %1270 }
 0x7e8   : > { %v1280_v56 = vmul.f32 %v1271_v52, %v1019_v30 }
 0x7eb   : > { %v1279_v53 = vpop.xlane.xlu1 %1278 }
 0x7ef   : > { %v1370_v54 = vpop.permute.xlu1 %1369 }
 0x7f0   : > { %v1372_v55 = vsel %vm474_vm1, %v1770_v34, %v1370_v54 }
 0x7f1   : > { %1911 = vmatmul.mubr.msk.f32.vlgmr.msra.gmra.mxu0 %vm627_vm3, %v1372_v55 }
 0x807   : > { %v1284_v57 = vpop.permute.xlu0 %1283 }
 0x808   : > { %v1286_v58 = vadd.f32 %v1284_v57, %v1280_v56 }
 0x80a   : > { %2028 = vtanh.f32 %v1286_v58 }
 0x817   : > { %v2029_v59 = vpop.eup %2028 }
 0x818   : > { %v1288_v60 = vmul.f32 %v2029_v59, %v1279_v53 }
 0x81a   : > { %1769 = vst.msk [vmem:[%s2730_s22 + $0x10] sm:$0xff] %vm553_vm2, %v1288_v60  ;;  %1904 = vmatmul.mubr.msk.f32.vlgmr.msra.gmra.mxu1 %vm553_vm2, %v1288_v60 }
 0x8b1   : > { %v1515_v61 = vpop.f32.mrf.mxu0 }
 0x8b3   : > { %v1912_v62 = vpop.f32.mrf.mxu0 }
 0x8da   : > { %v1442_v63 = vpop.f32.mrf.mxu1 }
 0x8db   : > { %v1516_v1 = vadd.f32 %v1515_v61, %v1442_v63 }
 0x8dc   : > { %v1905_v2 = vpop.f32.mrf.mxu1 }
 0x8dd   : > { %v1519_v8 = vadd.f32 %v2704_v19, %v1516_v1 }
 0x8df   : > { %v1775_v11 = vmul.f32 -1.442695, %v1519_v8 }
 0x8e1   : > { %2030 = vpow2.f32 %v1775_v11 }
 0x8ee   : > { %v2031_v12 = vpop.eup %2030 }
 0x8ef   : > { %v1523_v13 = vadd.f32 1.0, %v2031_v12 }
 0x8f1   : > { %2032 = vrcp.f32 %v1523_v13 }
 0x8f2   : > { %2034 = vtanh.f32 %v1519_v8 }
 0x8fe   : > { %v2033_v14 = vpop.eup %2032 }
 0x8ff   : > { %v1539_v15 = vmul.f32 %v2033_v14, %v2711_v31  ;;  %v1531_v16 = vmul.f32 %v2033_v14, %v2707_v27  ;;  %v1527_v17 = vmul.f32 %v2033_v14, %v2670_v10  ;;  %v2035_v27 = vpop.eup %2034 }
 0x901   : > { %1541 = vrot.lane.b32.xlu1 %v1539_v15, %s2297_s11  ;;  %1533 = vrot.lane.b32.xlu0 %v1531_v16, %s2295_s5  ;;  %v1528_v18 = vsel %vm553_vm2, %v1527_v17, 0.0 }
 0x920   : > { %1529 = vadd.xlane.f32.xlu0 %v1528_v18 }
 0x973   : > { %v1534_v19 = vpop.permute.xlu0 %1533  ;;  %v1542_v21 = vpop.permute.xlu1 %1541 }
 0x974   : > { %v1536_v20 = vsel %vm553_vm2, %v1534_v19, 0.0  ;;  %v1544_v31 = vsel %vm553_vm2, %v1542_v21, 0.0 }
 0x975   : > { %1537 = vadd.xlane.f32.xlu1 %v1536_v20 }
 0x979   : > { %1545 = vadd.xlane.f32.xlu1 %v1544_v31 }
 0x9a9   : > { %v1530_v22 = vpop.xlane.xlu0 %1529 }
 0x9aa   : > { %v1548_v23 = vmul.f32 %v2035_v27, %v1530_v22 }
 0x9ac   : > { %1550 = vrot.lane.b32.xlu0 %v1548_v23, %s2298_s25 }
 0x9fe   : > { %v1538_v10 = vpop.xlane.xlu1 %1537 }
 0x9ff   : > { %v1547_v24 = vmul.f32 %v1538_v10, %v1286_v58 }
 0xa02   : > { %v1546_v29 = vpop.xlane.xlu1 %1545 }
 0xa1e   : > { %v1551_v25 = vpop.permute.xlu0 %1550 }
 0xa1f   : > { %v1553_v26 = vadd.f32 %v1551_v25, %v1547_v24 }
 0xa21   : > { %2036 = vtanh.f32 %v1553_v26 }
 0xa2e   : > { %v2037_v28 = vpop.eup %2036 }
 0xa2f   : > { %v1555_v30 = vmul.f32 %v2037_v28, %v1546_v29 }
 0xa31   : > { %1776 = vst.msk [vmem:[%s2730_s22 + $0x18] sm:$0xff] %vm553_vm2, %v1555_v30 }
 0xa32   : > { %2215 = shalt.err (!%p2212_p8)
}
 0xa33   : > { %s2216_s6 = scalar_lea.hbm %s2825_s14, 512  ;;  %s2220_s16 = scalar_lea.hbm %s2941_s15, 1024 }
 0xa34   : > { %p2217_p6 = scmp.ne.s32.totalorder %s2825_s14, %s2216_s6  ;;  %p2221_p13 = scmp.lt.s32.totalorder %s2825_s14, %s2941_s15 }
 0xa35   : > { %p2222_p2 = scmp.lt.s32.totalorder %s2220_s16, %s2216_s6 }
 0xa36   : > { %p2218_p11 = pnand %p2217_p6, %p2942_p10 }
 0xa37   : > { %p2223_p7 = por %p2222_p2, %p2221_p13 }
 0xa38   : > { %p2219_p4 = pneg %p2218_p11 }
 0xa3a   : > { %p2224_p9 = pnand %p2223_p7, %p2219_p4 }
 0xa3c   : > { %2227 = shalt.err (!%p2224_p9)
}
 0xa3d   : > { %s2300_s11 = smov 128   ;;  %s2301_s26 = smov 256  }
 0xa3e   : > { %1929 = dma.vmem_to_hbm [thread:$0]  (%p2942_p10), %s2820_s4, 512, %s2825_s14, %s1559_s19, %s2300_s11, %s2301_s26, %s2296_s12  }
 0xa3f PF: > { %s2943_s21 = sld [smem:[#allocation20_spill]]  ;;  %p2946_p5 = scmp.ge.s32.totalorder %s2282_s30, 2 }
 0xa40   : > { %s2944_s18 = sld [smem:[#allocation25_spill]] }
 0xa45   : > { %s1586_s25 = sand.u32 1, %s2943_s21  }
 0xa46   : > { %p2945_p1 = scmp.ne.s32.totalorder %s2944_s18, 0  ;;  %s1587_s22 = scalar_lea.sflag [#allocation4], %s1586_s25 }
 0xa48   : > { %p1952_p12 = pnand %p2946_p5, %p2945_p1 }
 0xa4a   : > { %p1953_p0 = pneg %p1952_p12 }
 0xa4c   : > { %2265 = dma.done.wait (%p1953_p0), %s1587_s22, 512  }
 0xa4d   : > { %2267 = vsyncadd (%p1953_p0), %s1587_s22, 4294966784  ;;  %s2947_s30 = sld [smem:[#allocation22_spill]]  ;;  %s2950_s27 = smov %s2274_s28 }
 0xa4e   : > { %s2948_s1 = sld [smem:[#allocation21_spill]] }
 0xa4f   : > { %s2949_s29 = sld [smem:[#allocation23_spill]] }
 0xa53   : > { %p28_p3 = scmp.ge.s32.totalorder %s2947_s30, 4  }
 0xa54   : > { %s2951_s28 = smov %s2948_s1 }
 0xa55   :  { %30 = sbr.rel (!%p28_p3) target bundleno = 17 (0x11), region = 151 }
 0xa5a   :  { %1592 = vsyncpa [#allocation3], 1 }
 0xa5b   :  { %1594 = vsyncpa [#allocation3 + $0x1], 1 }
 0xa5c   :  { %1595 = vsyncpa [#allocation6], 1 }
 0xa5d   :  { %1597 = vsyncpa [#allocation6 + $0x1], 1 }
 0xa5e   :  { %1598 = vsyncpa [#allocation9], 1 }
 0xa5f   :  { %1600 = vsyncpa [#allocation9 + $0x1], 1 }
 0xa60   :  { %1601 = vsyncpa [#allocation12], 1 }
 0xa61   :  { %1602 = vsyncpa [#allocation4], 1 }
 0xa62   :  { %1604 = vsyncpa [#allocation4 + $0x1], 1 }

</bundles_post_ra>
